<compile_context>
chip_gen: v7x
topology: tpu7x:2x2x1
jax: 0.10.0
libtpu: 0.0.40
codegen_flags: <defaults>
</compile_context>

<pallas_src>
import functools
import math

import jax
import jax.numpy as jnp
from jax import lax
from jax.experimental import pallas as pl
from jax.experimental.pallas import tpu as pltpu


# ----------------------------------------------------------------------------
# Small helpers
# ----------------------------------------------------------------------------
def _pick_tile(n, max_tile=512):
    """Largest multiple-of-8 divisor of n that is <= max_tile (or n itself)."""
    if n <= max_tile:
        return n
    for t in range(max_tile, 7, -8):
        if n % t == 0:
            return t
    return n


# ----------------------------------------------------------------------------
# Pallas kernels
# ----------------------------------------------------------------------------
def _kv_proj_kernel(x_ref, w_ref, ok_ref, ov_ref):
    # Fused K/V projection: one matmul against the concatenated (Dkv, 2*inner) weight.
    acc = jnp.dot(x_ref[...], w_ref[...], preferred_element_type=jnp.float32)
    n = ok_ref.shape[-1]                   # inner (multiple of 128 -> clean split)
    ok_ref[...] = acc[:, :n].astype(ok_ref.dtype)
    ov_ref[...] = acc[:, n:].astype(ov_ref.dtype)


def _fused_attn_kernel(q_ref, wq_ref, k_ref, v_ref, wo_ref, bo_ref, o_ref, *,
                       heads, dim_head):
    # Per (batch, q-tile) block:
    #   q:   (tq, C)      bf16   raw query features
    #   wq:  (C, inner)   bf16   (softmax scale already folded in)
    #   k,v: (Sk, inner)  bf16   projected keys / values (resident in VMEM)
    #   wo:  (inner, Npad) bf16, bo: (1, Npad) f32
    #   o:   (tq, Npad)   f32    lane-dense output tile
    # Q projection (MXU, f32 accumulation), then bf16 for the score matmul.
    qp = jnp.dot(q_ref[...], wq_ref[...],
                 preferred_element_type=jnp.float32).astype(jnp.bfloat16)
    k = k_ref[...]
    v = v_ref[...]
    outs = []
    for h in range(heads):                 # static unroll over heads
        lo = h * dim_head
        qh = lax.slice_in_dim(qp, lo, lo + dim_head, axis=1)   # (tq, Dh) bf16
        kh = lax.slice_in_dim(k, lo, lo + dim_head, axis=1)    # (Sk, Dh) bf16
        vh = lax.slice_in_dim(v, lo, lo + dim_head, axis=1)    # (Sk, Dh) bf16
        # scores: contract the last dims directly (no k.T / XLU transpose).
        s = lax.dot_general(qh, kh, (((1,), (1,)), ((), ())),
                            preferred_element_type=jnp.float32)  # (tq, Sk) f32
        m = jnp.max(s, axis=-1, keepdims=True)
        p = jnp.exp(s - m)
        denom = jnp.sum(p, axis=-1, keepdims=True)
        o = jnp.dot(p.astype(jnp.bfloat16), vh,
                    preferred_element_type=jnp.float32)          # (tq, Dh) f32
        # Normalize after the PV matmul; approx reciprocal runs on the EUP slot.
        outs.append(o * pl.reciprocal(denom, approx=True))
    attn = (outs[0] if len(outs) == 1
            else jnp.concatenate(outs, axis=-1)).astype(jnp.bfloat16)  # (tq, inner)
    # Output projection + bias, single lane-dense store.
    acc = jnp.dot(attn, wo_ref[...], preferred_element_type=jnp.float32)
    o_ref[...] = (acc + bo_ref[...]).astype(o_ref.dtype)


# ----------------------------------------------------------------------------
# Pallas wrappers
# ----------------------------------------------------------------------------
def _kv_linear_3d(x, w_kv, inner, *, max_tile=512):
    """x: (B, Sk, Dkv) bf16, w_kv: (Dkv, 2*inner) bf16 -> (k_proj, v_proj) (B, Sk, inner)."""
    B, S, K = x.shape
    tm = _pick_tile(S, max_tile)
    out_sd = jax.ShapeDtypeStruct((B, S, inner), jnp.bfloat16)
    return pl.pallas_call(
        _kv_proj_kernel,
        out_shape=(out_sd, out_sd),
        grid_spec=pltpu.PrefetchScalarGridSpec(
            num_scalar_prefetch=0,
            grid=(B, S // tm),
            in_specs=[pl.BlockSpec((None, tm, K), lambda b, i: (b, i, 0)),
                      pl.BlockSpec((K, 2 * inner), lambda b, i: (0, 0))],
            out_specs=(pl.BlockSpec((None, tm, inner), lambda b, i: (b, i, 0)),
                       pl.BlockSpec((None, tm, inner), lambda b, i: (b, i, 0))),
        ),
        compiler_params=pltpu.CompilerParams(
            dimension_semantics=("parallel", "parallel")),
    )(x, w_kv)


def _fused_q_attn_out(q_in, wq, k_proj, v_proj, wo, bo, heads, dim_head, *,
                      max_tq=512):
    """q_in: (B, Sq, C) bf16, weights bf16/f32, k/v_proj: (B, Sk, inner) bf16
       -> (B, Sq, Npad) f32 (padding sliced off by the caller)."""
    B, Sq, C = q_in.shape
    Sk = k_proj.shape[1]
    inner = heads * dim_head
    n_pad = wo.shape[1]
    tq = _pick_tile(Sq, max_tq)
    kernel = functools.partial(_fused_attn_kernel, heads=heads, dim_head=dim_head)
    return pl.pallas_call(
        kernel,
        out_shape=jax.ShapeDtypeStruct((B, Sq, n_pad), jnp.float32),
        grid_spec=pltpu.PrefetchScalarGridSpec(
            num_scalar_prefetch=0,
            grid=(B, Sq // tq),
            in_specs=[pl.BlockSpec((None, tq, C), lambda b, i: (b, i, 0)),
                      pl.BlockSpec((C, inner), lambda b, i: (0, 0)),
                      pl.BlockSpec((None, Sk, inner), lambda b, i: (b, 0, 0)),
                      pl.BlockSpec((None, Sk, inner), lambda b, i: (b, 0, 0)),
                      pl.BlockSpec((inner, n_pad), lambda b, i: (0, 0)),
                      pl.BlockSpec((1, n_pad), lambda b, i: (0, 0))],
            out_specs=pl.BlockSpec((None, tq, n_pad), lambda b, i: (b, i, 0)),
        ),
        compiler_params=pltpu.CompilerParams(
            dimension_semantics=("parallel", "parallel")),
    )(q_in, wq, k_proj, v_proj, wo, bo)


# ----------------------------------------------------------------------------
# CrossAttention forward (matches the PyTorch module semantics)
# ----------------------------------------------------------------------------
@functools.partial(jax.jit, static_argnames=("heads", "dim_head"))
def cross_attention_forward(query, key_value, params, heads, dim_head):
    # query: (B, C, H, W)  NCHW, key_value: (B, S_kv, D_kv)
    B, C, Hh, Ww = query.shape
    S_q = Hh * Ww
    inner = heads * dim_head
    scale = dim_head ** (-0.5)

    # ---- trace-time weight prep (bf16 MXU operands, scale folded into W_q) ----
    wq = (params["wq"] * scale).astype(jnp.bfloat16)                     # (C, inner)
    w_kv = jnp.concatenate([params["wk"], params["wv"]], axis=1).astype(jnp.bfloat16)
    n_pad = ((C + 127) // 128) * 128                                     # lane-dense output N
    wo = jnp.zeros((inner, n_pad), params["wo"].dtype)
    wo = wo.at[:, :C].set(params["wo"]).astype(jnp.bfloat16)
    bo = jnp.zeros((1, n_pad), jnp.float32).at[0, :C].set(params["bo"].astype(jnp.float32))

    # glue: NCHW -> (B, S_q, C), bf16 (fused with the cast by XLA)
    q_in = query.reshape(B, C, S_q).transpose(0, 2, 1).astype(jnp.bfloat16)
    kv_in = key_value.astype(jnp.bfloat16)

    # K/V projections fused into one small kernel (tiny outputs stay resident below)
    k_proj, v_proj = _kv_linear_3d(kv_in, w_kv, inner)    # (B, S_kv, inner) x2

    # Fused Q projection + per-head attention + output projection
    out = _fused_q_attn_out(q_in, wq, k_proj, v_proj, wo, bo, heads, dim_head)
    out = out[:, :, :C]                                   # drop lane padding
    # dropout p=0.0 -> identity
    return out.transpose(0, 2, 1).reshape(B, C, Hh, Ww)


# ----------------------------------------------------------------------------
# Pure-JAX f32 reference for validation
# ----------------------------------------------------------------------------
def reference_forward(query, key_value, params, heads, dim_head):
    B, C, Hh, Ww = query.shape
    S_q = Hh * Ww
    inner = heads * dim_head
    qf = query.reshape(B, C, S_q).transpose(0, 2, 1)
    qp = qf @ params["wq"]
    kp = key_value @ params["wk"]
    vp = key_value @ params["wv"]
    q4 = qp.reshape(B, S_q, heads, dim_head).transpose(0, 2, 1, 3)
    k4 = kp.reshape(B, -1, heads, dim_head).transpose(0, 2, 1, 3)
    v4 = vp.reshape(B, -1, heads, dim_head).transpose(0, 2, 1, 3)
    w = jnp.einsum("bhqd,bhkd->bhqk", q4, k4) * dim_head ** (-0.5)
    w = jax.nn.softmax(w, axis=-1)
    a = jnp.einsum("bhqk,bhkd->bhqd", w, v4)
    a = a.transpose(0, 2, 1, 3).reshape(B, S_q, inner)
    o = a @ params["wo"] + params["bo"]
    return o.transpose(0, 2, 1).reshape(B, C, Hh, Ww)


# ----------------------------------------------------------------------------
if __name__ == "__main__":
    # Small shapes consistent with the module's forward:
    B, C, Hh, Ww = 2, 4, 16, 16           # query_dim = 4
    S_kv, D_kv = 8, 32                    # key_value_dim = 32
    heads, dim_head = 2, 64               # inner_dim = 128

    key = jax.random.PRNGKey(0)
    k_q, k_kv, k_wq, k_wk, k_wv, k_wo, k_bo = jax.random.split(key, 7)

    query = jax.random.normal(k_q, (B, C, Hh, Ww), dtype=jnp.float32)
    key_value = jax.random.normal(k_kv, (B, S_kv, D_kv), dtype=jnp.float32)

    inner = heads * dim_head

    def uinit(k, shape, fan_in):
        bound = 1.0 / math.sqrt(fan_in)
        return jax.random.uniform(k, shape, jnp.float32, -bound, bound)

    params = {
        # stored as (in_features, out_features) so kernels do x @ w
        "wq": uinit(k_wq, (C, inner), C),
        "wk": uinit(k_wk, (D_kv, inner), D_kv),
        "wv": uinit(k_wv, (D_kv, inner), D_kv),
        "wo": uinit(k_wo, (inner, C), inner),
        "bo": uinit(k_bo, (C,), inner),
    }

    out = cross_attention_forward(query, key_value, params, heads, dim_head)
    out = jax.block_until_ready(out)

    ref = reference_forward(query, key_value, params, heads, dim_head)
    assert out.shape == (B, C, Hh, Ww)
    # bf16 MXU operands + approx reciprocal -> relaxed tolerance vs the f32 reference
    assert jnp.allclose(out, ref, atol=5e-2, rtol=5e-2), "mismatch vs reference"

    print("KERNEL_OK")
</pallas_src>

<mosaic_0001>
module attributes {stable_mosaic.version = 11 : i64} {
  func.func @_kv_proj_kernel(%arg0: i32, %arg1: i32, %arg2: memref<1x8x32xbf16, #tpu.memory_space<vmem>>, %arg3: memref<32x256xbf16, #tpu.memory_space<vmem>>, %arg4: memref<1x8x128xbf16, #tpu.memory_space<vmem>>, %arg5: memref<1x8x128xbf16, #tpu.memory_space<vmem>>) attributes {dimension_semantics = [#tpu.dimension_semantics<parallel>, #tpu.dimension_semantics<parallel>], iteration_bounds = array<i64: 2, 1>, scalar_prefetch = 0 : i64, scratch_operands = 0 : i64, tpu.core_type = #tpu.core_type<tc>, window_params = [{transform_indices = @transform_0, window_bounds = array<i64: 1, 8, 32>}, {pipeline_mode = #tpu.pipeline_mode<synchronous>, transform_indices = @transform_1, window_bounds = array<i64: 32, 256>}, {transform_indices = @transform_2, window_bounds = array<i64: 1, 8, 128>}, {transform_indices = @transform_3, window_bounds = array<i64: 1, 8, 128>}]} {
    %c0 = arith.constant 0 : index
    %c0_0 = arith.constant 0 : index
    %c0_1 = arith.constant 0 : index
    %0 = vector.load %arg2[%c0, %c0_0, %c0_1] : memref<1x8x32xbf16, #tpu.memory_space<vmem>>, vector<1x8x32xbf16>
    %1 = vector.shape_cast %0 : vector<1x8x32xbf16> to vector<8x32xbf16>
    %c0_2 = arith.constant 0 : index
    %c0_3 = arith.constant 0 : index
    %2 = vector.load %arg3[%c0_2, %c0_3] : memref<32x256xbf16, #tpu.memory_space<vmem>>, vector<32x256xbf16>
    %cst = arith.constant dense<0.000000e+00> : vector<8x256xf32>
    %3 = tpu.matmul %1, %2, %cst {dimension_numbers = #tpu.dot_dimension_numbers<[1], [0], [0], [1], [0, 0, 1, 1], [], []>} : vector<8x32xbf16>, vector<32x256xbf16>, vector<8x256xf32> -> vector<8x256xf32>
    %4 = vector.extract_strided_slice %3 {offsets = [0, 0], sizes = [8, 128], strides = [1, 1]} : vector<8x256xf32> to vector<8x128xf32>
    %5 = arith.truncf %4 : vector<8x128xf32> to vector<8x128xbf16>
    %c0_4 = arith.constant 0 : index
    %c0_5 = arith.constant 0 : index
    %c0_6 = arith.constant 0 : index
    %6 = vector.load %arg4[%c0_4, %c0_5, %c0_6] : memref<1x8x128xbf16, #tpu.memory_space<vmem>>, vector<1x8x128xbf16>
    %7 = vector.shape_cast %6 : vector<1x8x128xbf16> to vector<8x128xbf16>
    %8 = vector.shape_cast %5 : vector<8x128xbf16> to vector<1x8x128xbf16>
    tpu.vector_store %arg4[%c0_4, %c0_5, %c0_6], %8 {strides = array<i32>} : memref<1x8x128xbf16, #tpu.memory_space<vmem>>, vector<1x8x128xbf16>,
    %9 = vector.extract_strided_slice %3 {offsets = [0, 128], sizes = [8, 128], strides = [1, 1]} : vector<8x256xf32> to vector<8x128xf32>
    %10 = arith.truncf %9 : vector<8x128xf32> to vector<8x128xbf16>
    %c0_7 = arith.constant 0 : index
    %c0_8 = arith.constant 0 : index
    %c0_9 = arith.constant 0 : index
    %11 = vector.load %arg5[%c0_7, %c0_8, %c0_9] : memref<1x8x128xbf16, #tpu.memory_space<vmem>>, vector<1x8x128xbf16>
    %12 = vector.shape_cast %11 : vector<1x8x128xbf16> to vector<8x128xbf16>
    %13 = vector.shape_cast %10 : vector<8x128xbf16> to vector<1x8x128xbf16>
    tpu.vector_store %arg5[%c0_7, %c0_8, %c0_9], %13 {strides = array<i32>} : memref<1x8x128xbf16, #tpu.memory_space<vmem>>, vector<1x8x128xbf16>,
    return
  }
  func.func @transform_0(%arg0: i32, %arg1: i32) -> (i32, i32, i32) {
    %c0_i32 = arith.constant 0 : i32
    %c0_i32_0 = arith.constant 0 : i32
    return %arg0, %arg1, %c0_i32 : i32, i32, i32
  }
  func.func @transform_1(%arg0: i32, %arg1: i32) -> (i32, i32) {
    %c0_i32 = arith.constant 0 : i32
    %c0_i32_0 = arith.constant 0 : i32
    %c0_i32_1 = arith.constant 0 : i32
    return %c0_i32, %c0_i32_0 : i32, i32
  }
  func.func @transform_2(%arg0: i32, %arg1: i32) -> (i32, i32, i32) {
    %c0_i32 = arith.constant 0 : i32
    %c0_i32_0 = arith.constant 0 : i32
    return %arg0, %arg1, %c0_i32 : i32, i32, i32
  }
  func.func @transform_3(%arg0: i32, %arg1: i32) -> (i32, i32, i32) {
    %c0_i32 = arith.constant 0 : i32
    %c0_i32_0 = arith.constant 0 : i32
    return %arg0, %arg1, %c0_i32 : i32, i32, i32
  }
}

module attributes {stable_mosaic.version = 11 : i64} {
  func.func @_fused_attn_kernel(%arg0: i32, %arg1: i32, %arg2: memref<1x256x4xbf16, #tpu.memory_space<vmem>>, %arg3: memref<4x128xbf16, #tpu.memory_space<vmem>>, %arg4: memref<1x8x128xbf16, #tpu.memory_space<vmem>>, %arg5: memref<1x8x128xbf16, #tpu.memory_space<vmem>>, %arg6: memref<128x128xbf16, #tpu.memory_space<vmem>>, %arg7: memref<1x128xf32, #tpu.memory_space<vmem>>, %arg8: memref<1x256x128xf32, #tpu.memory_space<vmem>>) attributes {dimension_semantics = [#tpu.dimension_semantics<parallel>, #tpu.dimension_semantics<parallel>], iteration_bounds = array<i64: 2, 1>, scalar_prefetch = 0 : i64, scratch_operands = 0 : i64, tpu.core_type = #tpu.core_type<tc>, window_params = [{transform_indices = @transform_0, window_bounds = array<i64: 1, 256, 4>}, {pipeline_mode = #tpu.pipeline_mode<synchronous>, transform_indices = @transform_1, window_bounds = array<i64: 4, 128>}, {transform_indices = @transform_2, window_bounds = array<i64: 1, 8, 128>}, {transform_indices = @transform_3, window_bounds = array<i64: 1, 8, 128>}, {pipeline_mode = #tpu.pipeline_mode<synchronous>, transform_indices = @transform_4, window_bounds = array<i64: 128, 128>}, {pipeline_mode = #tpu.pipeline_mode<synchronous>, transform_indices = @transform_5, window_bounds = array<i64: 1, 128>}, {transform_indices = @transform_6, window_bounds = array<i64: 1, 256, 128>}]} {
    %c0 = arith.constant 0 : index
    %c0_0 = arith.constant 0 : index
    %c0_1 = arith.constant 0 : index
    %0 = vector.load %arg2[%c0, %c0_0, %c0_1] : memref<1x256x4xbf16, #tpu.memory_space<vmem>>, vector<1x256x4xbf16>
    %1 = vector.shape_cast %0 : vector<1x256x4xbf16> to vector<256x4xbf16>
    %c0_2 = arith.constant 0 : index
    %c0_3 = arith.constant 0 : index
    %2 = vector.load %arg3[%c0_2, %c0_3] : memref<4x128xbf16, #tpu.memory_space<vmem>>, vector<4x128xbf16>
    %cst = arith.constant dense<0.000000e+00> : vector<256x128xf32>
    %3 = tpu.matmul %1, %2, %cst {dimension_numbers = #tpu.dot_dimension_numbers<[1], [0], [0], [1], [0, 0, 1, 1], [], []>} : vector<256x4xbf16>, vector<4x128xbf16>, vector<256x128xf32> -> vector<256x128xf32>
    %4 = arith.truncf %3 : vector<256x128xf32> to vector<256x128xbf16>
    %c0_4 = arith.constant 0 : index
    %c0_5 = arith.constant 0 : index
    %c0_6 = arith.constant 0 : index
    %5 = vector.load %arg4[%c0_4, %c0_5, %c0_6] : memref<1x8x128xbf16, #tpu.memory_space<vmem>>, vector<1x8x128xbf16>
    %6 = vector.shape_cast %5 : vector<1x8x128xbf16> to vector<8x128xbf16>
    %c0_7 = arith.constant 0 : index
    %c0_8 = arith.constant 0 : index
    %c0_9 = arith.constant 0 : index
    %7 = vector.load %arg5[%c0_7, %c0_8, %c0_9] : memref<1x8x128xbf16, #tpu.memory_space<vmem>>, vector<1x8x128xbf16>
    %8 = vector.shape_cast %7 : vector<1x8x128xbf16> to vector<8x128xbf16>
    %9 = vector.extract_strided_slice %4 {offsets = [0, 0], sizes = [256, 64], strides = [1, 1]} : vector<256x128xbf16> to vector<256x64xbf16>
    %10 = vector.extract_strided_slice %6 {offsets = [0, 0], sizes = [8, 64], strides = [1, 1]} : vector<8x128xbf16> to vector<8x64xbf16>
    %11 = vector.extract_strided_slice %8 {offsets = [0, 0], sizes = [8, 64], strides = [1, 1]} : vector<8x128xbf16> to vector<8x64xbf16>
    %cst_10 = arith.constant dense<0.000000e+00> : vector<256x8xf32>
    %12 = tpu.matmul %9, %10, %cst_10 {dimension_numbers = #tpu.dot_dimension_numbers<[1], [1], [0], [0], [0, 0, 1, 0], [], []>} : vector<256x64xbf16>, vector<8x64xbf16>, vector<256x8xf32> -> vector<256x8xf32>
    %cst_11 = arith.constant dense<0xFF800000> : vector<256xf32>
    %13 = vector.multi_reduction <maximumf>, %12, %cst_11 [1] : vector<256x8xf32> to vector<256xf32>
    %14 = vector.shape_cast %13 : vector<256xf32> to vector<256x1xf32>
    %15 = vector.broadcast %14 : vector<256x1xf32> to vector<256x8xf32>
    %16 = arith.subf %12, %15 : vector<256x8xf32>
    %17 = math.exp %16 : vector<256x8xf32>
    %cst_12 = arith.constant dense<0.000000e+00> : vector<256xf32>
    %18 = vector.multi_reduction <add>, %17, %cst_12 [1] : vector<256x8xf32> to vector<256xf32>
    %19 = vector.shape_cast %18 : vector<256xf32> to vector<256x1xf32>
    %20 = arith.truncf %17 : vector<256x8xf32> to vector<256x8xbf16>
    %cst_13 = arith.constant dense<0.000000e+00> : vector<256x64xf32>
    %21 = tpu.matmul %20, %11, %cst_13 {dimension_numbers = #tpu.dot_dimension_numbers<[1], [0], [0], [1], [0, 0, 1, 1], [], []>} : vector<256x8xbf16>, vector<8x64xbf16>, vector<256x64xf32> -> vector<256x64xf32>
    %22 = tpu.reciprocal %19 {approx = true} : vector<256x1xf32> -> vector<256x1xf32>
    %23 = vector.broadcast %22 : vector<256x1xf32> to vector<256x64xf32>
    %24 = arith.mulf %21, %23 : vector<256x64xf32>
    %25 = vector.extract_strided_slice %4 {offsets = [0, 64], sizes = [256, 64], strides = [1, 1]} : vector<256x128xbf16> to vector<256x64xbf16>
    %26 = vector.extract_strided_slice %6 {offsets = [0, 64], sizes = [8, 64], strides = [1, 1]} : vector<8x128xbf16> to vector<8x64xbf16>
    %27 = vector.extract_strided_slice %8 {offsets = [0, 64], sizes = [8, 64], strides = [1, 1]} : vector<8x128xbf16> to vector<8x64xbf16>
    %cst_14 = arith.constant dense<0.000000e+00> : vector<256x8xf32>
    %28 = tpu.matmul %25, %26, %cst_14 {dimension_numbers = #tpu.dot_dimension_numbers<[1], [1], [0], [0], [0, 0, 1, 0], [], []>} : vector<256x64xbf16>, vector<8x64xbf16>, vector<256x8xf32> -> vector<256x8xf32>
    %cst_15 = arith.constant dense<0xFF800000> : vector<256xf32>
    %29 = vector.multi_reduction <maximumf>, %28, %cst_15 [1] : vector<256x8xf32> to vector<256xf32>
    %30 = vector.shape_cast %29 : vector<256xf32> to vector<256x1xf32>
    %31 = vector.broadcast %30 : vector<256x1xf32> to vector<256x8xf32>
    %32 = arith.subf %28, %31 : vector<256x8xf32>
    %33 = math.exp %32 : vector<256x8xf32>
    %cst_16 = arith.constant dense<0.000000e+00> : vector<256xf32>
    %34 = vector.multi_reduction <add>, %33, %cst_16 [1] : vector<256x8xf32> to vector<256xf32>
    %35 = vector.shape_cast %34 : vector<256xf32> to vector<256x1xf32>
    %36 = arith.truncf %33 : vector<256x8xf32> to vector<256x8xbf16>
    %cst_17 = arith.constant dense<0.000000e+00> : vector<256x64xf32>
    %37 = tpu.matmul %36, %27, %cst_17 {dimension_numbers = #tpu.dot_dimension_numbers<[1], [0], [0], [1], [0, 0, 1, 1], [], []>} : vector<256x8xbf16>, vector<8x64xbf16>, vector<256x64xf32> -> vector<256x64xf32>
    %38 = tpu.reciprocal %35 {approx = true} : vector<256x1xf32> -> vector<256x1xf32>
    %39 = vector.broadcast %38 : vector<256x1xf32> to vector<256x64xf32>
    %40 = arith.mulf %37, %39 : vector<256x64xf32>
    %41 = tpu.concatenate %24, %40 in 1 : vector<256x64xf32>, vector<256x64xf32> -> vector<256x128xf32>
    %42 = arith.truncf %41 : vector<256x128xf32> to vector<256x128xbf16>
    %c0_18 = arith.constant 0 : index
    %c0_19 = arith.constant 0 : index
    %43 = vector.load %arg6[%c0_18, %c0_19] : memref<128x128xbf16, #tpu.memory_space<vmem>>, vector<128x128xbf16>
    %cst_20 = arith.constant dense<0.000000e+00> : vector<256x128xf32>
    %44 = tpu.matmul %42, %43, %cst_20 {dimension_numbers = #tpu.dot_dimension_numbers<[1], [0], [0], [1], [0, 0, 1, 1], [], []>} : vector<256x128xbf16>, vector<128x128xbf16>, vector<256x128xf32> -> vector<256x128xf32>
    %c0_21 = arith.constant 0 : index
    %c0_22 = arith.constant 0 : index
    %45 = vector.load %arg7[%c0_21, %c0_22] : memref<1x128xf32, #tpu.memory_space<vmem>>, vector<1x128xf32>
    %46 = vector.broadcast %45 : vector<1x128xf32> to vector<256x128xf32>
    %47 = arith.addf %44, %46 : vector<256x128xf32>
    %c0_23 = arith.constant 0 : index
    %c0_24 = arith.constant 0 : index
    %c0_25 = arith.constant 0 : index
    %48 = vector.load %arg8[%c0_23, %c0_24, %c0_25] : memref<1x256x128xf32, #tpu.memory_space<vmem>>, vector<1x256x128xf32>
    %49 = vector.shape_cast %48 : vector<1x256x128xf32> to vector<256x128xf32>
    %50 = vector.shape_cast %47 : vector<256x128xf32> to vector<1x256x128xf32>
    tpu.vector_store %arg8[%c0_23, %c0_24, %c0_25], %50 {strides = array<i32>} : memref<1x256x128xf32, #tpu.memory_space<vmem>>, vector<1x256x128xf32>,
    return
  }
  func.func @transform_0(%arg0: i32, %arg1: i32) -> (i32, i32, i32) {
    %c0_i32 = arith.constant 0 : i32
    %c0_i32_0 = arith.constant 0 : i32
    return %arg0, %arg1, %c0_i32 : i32, i32, i32
  }
  func.func @transform_1(%arg0: i32, %arg1: i32) -> (i32, i32) {
    %c0_i32 = arith.constant 0 : i32
    %c0_i32_0 = arith.constant 0 : i32
    %c0_i32_1 = arith.constant 0 : i32
    return %c0_i32, %c0_i32_0 : i32, i32
  }
  func.func @transform_2(%arg0: i32, %arg1: i32) -> (i32, i32, i32) {
    %c0_i32 = arith.constant 0 : i32
    %c0_i32_0 = arith.constant 0 : i32
    %c0_i32_1 = arith.constant 0 : i32
    return %arg0, %c0_i32, %c0_i32_0 : i32, i32, i32
  }
  func.func @transform_3(%arg0: i32, %arg1: i32) -> (i32, i32, i32) {
    %c0_i32 = arith.constant 0 : i32
    %c0_i32_0 = arith.constant 0 : i32
    %c0_i32_1 = arith.constant 0 : i32
    return %arg0, %c0_i32, %c0_i32_0 : i32, i32, i32
  }
  func.func @transform_4(%arg0: i32, %arg1: i32) -> (i32, i32) {
    %c0_i32 = arith.constant 0 : i32
    %c0_i32_0 = arith.constant 0 : i32
    %c0_i32_1 = arith.constant 0 : i32
    return %c0_i32, %c0_i32_0 : i32, i32
  }
  func.func @transform_5(%arg0: i32, %arg1: i32) -> (i32, i32) {
    %c0_i32 = arith.constant 0 : i32
    %c0_i32_0 = arith.constant 0 : i32
    %c0_i32_1 = arith.constant 0 : i32
    return %c0_i32, %c0_i32_0 : i32, i32
  }
  func.func @transform_6(%arg0: i32, %arg1: i32) -> (i32, i32, i32) {
    %c0_i32 = arith.constant 0 : i32
    %c0_i32_0 = arith.constant 0 : i32
    return %arg0, %arg1, %c0_i32 : i32, i32, i32
  }
}

</mosaic_0001>

<bundles_post_ra>
// kernel: cross_attention_forward.2
= control target key start
LH: loop header
LB: loop body
LE: loop exit
PB: predicated region body
PF: predicated region fallthrough
CT: control target
= control target key end

     0   :  { %s497_s12 = smov 0   ;;  %s499_s13 = smov 0   ;;  %s545_s0 = inlined_call_operand.vmem [shape: bf16[2,8,32], index: 0, kind: input, shape index: {}]   ;;  %s546_s1 = inlined_call_operand.vmem [shape: bf16[32,256], index: 1, kind: input, shape index: {}]   ;;  %s547_s2 = inlined_call_operand.vmem [shape: bf16[2,8,128], index: 2, kind: output, shape index: {0}]   ;;  %s548_s3 = inlined_call_operand.vmem [shape: bf16[2,8,128], index: 3, kind: output, shape index: {1}]  }
   0x1   :  { %s501_s14 = smov 0  }
   0x2 LB: > { %s26_s15 = sadd.s32 1, %s470_s13  ;;  %p410_p0 = scmp.ge.s32.totalorder %s474_s14, 1  ;;  %s474_s14 = sphi %s501_s14, %s14_s14   ;;  %s470_s13 = sphi %s499_s13, %s550_s13   ;;  %s466_s12 = sphi %s497_s12, %s549_s12  }
   0x3   : > { %p28_p1 = scmp.ge.s32.totalorder %s26_s15, 2  ;;  %p160_p2 = scmp.lt.s32.totalorder %s474_s14, 3 }
   0x5   : > { %s552_s15 = smov (%p28_p1, %s26_s15), 0  ;;  %p161_p3 = pnand %p410_p0, %p160_p2 }
   0x6   : > { %v446_v0 = vld [vmem:[%s546_s1 + $0x4] ss:$8 sps:$4 sm:$0xff] (!%p161_p3)   ;;  %p195_p4 = scmp.lt.s32.totalorder (!%p161_p3), %s466_s12, 1  ;;  %v448_v1 = vld [vmem:[%s546_s1] ss:$8 sps:$4 sm:$0xff] (!%p161_p3)   ;;  %v476_v2 = vmov (!%p161_p3), 0  }
   0x7   : > { %164 = sbr.rel (%p161_p3) target bundleno = 234 (0xea), region = 28  ;;  %278 = vmatprep.mubr.bf16.mxu0 (!%p161_p3), %v476_v2  ;;  %246 = vmatprep.subr.bf16.mxu0 (!%p161_p3), %v446_v0  ;;  %v449_v3 = vld [vmem:[%s546_s1 + $0x14] ss:$8 sps:$4 sm:$0xff] (!%p161_p3)   ;;  %v451_v4 = vld [vmem:[%s546_s1 + $0x10] ss:$8 sps:$4 sm:$0xff] (!%p161_p3)   ;;  %vm242_vm0 = vcmask (!%p161_p3), 261120  }
   0x8   : > { %247 = vmatpush1.bf16.msra.mxu0 (!%p161_p3), %v448_v1 }
   0x9   : > { %248 = vmatprep.subr.bf16.mxu0 (!%p161_p3), %v449_v3 }
   0xc   : > { %249 = vmatpush1.bf16.msra.mxu0 (!%p161_p3), %v451_v4 }
   0xe   : > { %s554_s12 = smov (!%p195_p4, %s466_s12), 1 }
   0xf   : > { %s411_s24 = sshll.u32 %s554_s12, 2 }
  0x10   : > { %s201_s27 = scalar_lea.vmem %s545_s0, %s411_s24  ;;  %s208_s30 = scalar_lea.vmem %s547_s2, %s411_s24 }
  0x11   : > { %v217_v5 = vld [vmem:[%s201_s27] sm:$0xf]  ;;  %s215_s6 = scalar_lea.vmem %s548_s3, %s411_s24 }
  0x12   : > { %418 = vmatmul.mubr.msk.bf16.vlgmr.msra.gmra.mrb[0].mxu0 %vm242_vm0, %v217_v5 }
  0xe5   : > { %v280_v6 = vpop.f32.mrb[0].mxu0 }
  0xe6   : > { %v287_v7 = vpack.c.bf16 %v280_v6, %v280_v6  ;;  %v282_v8 = vpop.f32.mrb[1].mxu0 }
  0xe7   : > { %v289_v9 = vpack.c.bf16 %v282_v8, %v282_v8  ;;  %v284_v10 = vpop.f32.mrb[2].mxu0 }
  0xe8   : > { %288 = vst [vmem:[%s208_s30] sm:$0xf] %v287_v7  ;;  %v285_v11 = vpop.f32.mrb[3].mxu0 }
  0xe9   : > { %290 = vst [vmem:[%s215_s6] sm:$0xf] %v289_v9 }
  0xea PF: > { %s14_s14 = sadd.s32 1, %s474_s14   ;;  %s549_s12 = smov %s470_s13 }
  0xeb   : > { %p11_p5 = scmp.ge.s32.totalorder %s14_s14, 4   ;;  %s550_s13 = smov %s552_s15 }
  0xed   :  { %13 = sbr.rel (!%p11_p5) target bundleno = 2 (0x2), region = 70 }

// kernel: cross_attention_forward.3
= control target key start
LH: loop header
LB: loop body
LE: loop exit
PB: predicated region body
PF: predicated region fallthrough
CT: control target
= control target key end

     0   :  { %s3768_s21 = smov 0   ;;  %s3770_s22 = smov 0   ;;  %s4736_s0 = inlined_call_operand.vmem [shape: bf16[2,256,4], index: 0, kind: input, shape index: {}]   ;;  %s4737_s1 = inlined_call_operand.vmem [shape: bf16[4,128], index: 1, kind: input, shape index: {}]   ;;  %s4738_s2 = inlined_call_operand.vmem [shape: bf16[2,8,128], index: 2, kind: input, shape index: {}]   ;;  %s4739_s3 = inlined_call_operand.vmem [shape: bf16[2,8,128], index: 3, kind: input, shape index: {}]   ;;  %s4740_s4 = inlined_call_operand.vmem [shape: bf16[128,128], index: 4, kind: input, shape index: {}]   ;;  %s4741_s5 = inlined_call_operand.vmem [shape: f32[1,128], index: 5, kind: input, shape index: {}]   ;;  %s4742_s6 = inlined_call_operand.vmem [shape: f32[2,256,128], index: 6, kind: output, shape index: {}]  }
   0x1   :  { %s3772_s23 = smov 0  }
   0x2 LB: > { %s28_s24 = sadd.s32 1, %s3726_s22  ;;  %p2871_p0 = scmp.ge.s32.totalorder %s3730_s23, 1  ;;  %s3730_s23 = sphi %s3772_s23, %s16_s23   ;;  %s3726_s22 = sphi %s3770_s22, %s4772_s22   ;;  %s3722_s21 = sphi %s3768_s21, %s4771_s21  }
   0x3   : > { %p30_p1 = scmp.ge.s32.totalorder %s28_s24, 2  ;;  %p251_p2 = scmp.lt.s32.totalorder %s3730_s23, 3 }
   0x5   : > { %s4774_s24 = smov (%p30_p1, %s28_s24), 0  ;;  %p252_p3 = pnand %p2871_p0, %p251_p2 }
   0x7   : > { %255 = sbr.rel (%p252_p3) target bundleno = 1416 (0x588), region = 44 }
   0xe   : > { %v358_v0 = vld [vmem:[%s4737_s1] sm:$0x3]  ;;  %vm488_vm0 = vcmask 1041408   ;;  %p298_p4 = scmp.lt.s32.totalorder %s3722_s21, 1  ;;  %vm439_vm1 = vcmask 31744   ;;  %vm671_vm2 = vcmask 523264  }
   0xf   : > { %3316 = vmatprep.subr.msk.bf16.mxu0 %vm488_vm0, %v358_v0  ;;  %v490_v1 = vsel %vm488_vm0, %v358_v0, 0  ;;  %s3732_s11 = smov 64   ;;  %vm884_vm3 = vcmask 64512   ;;  %vm1237_vm4 = vcmask 1043456  }
  0x10   : > { %3099 = vmatpush3.bf16.msra.mxu0 %v490_v1  ;;  %s4776_s21 = smov (!%p298_p4, %s3722_s21), 1 }
  0x11   : > { %s2987_s27 = sshll.u32 %s4776_s21, 7  ;;  %s2874_s7 = sshll.u32 %s4776_s21, 2 }
  0x12   : > { %s3795_s30 = scalar_lea.vmem %s4736_s0, %s2987_s27  ;;  %s310_s10 = scalar_lea.vmem %s4738_s2, %s2874_s7 }
  0x13   : > { %v3426_v2 = vld [vmem:[%s3795_s30] sm:$0xff]   ;;  %v3427_v3 = vld [vmem:[%s3795_s30 + $0x8] sm:$0xff]   ;;  %v3428_v4 = vld [vmem:[%s3795_s30 + $0x10] sm:$0xff]   ;;  %s314_s14 = scalar_lea.vmem %s4739_s3, %s2874_s7 }
  0x14   : > { %3100 = vmatprep.mubr.msk.bf16.mxu0 %vm439_vm1, %v3426_v2  ;;  %v3429_v5 = vld [vmem:[%s3795_s30 + $0x18] sm:$0xff]   ;;  %v3430_v6 = vld [vmem:[%s3795_s30 + $0x20] sm:$0xff]   ;;  %v3431_v7 = vld [vmem:[%s3795_s30 + $0x28] sm:$0xff]  }
  0x15   : > { %3101 = vmatmul.mubr.msk.bf16.vlgmr.msra.gmra.mrb[0].mxu0 %vm439_vm1, %v3427_v3  ;;  %v3432_v8 = vld [vmem:[%s3795_s30 + $0x30] sm:$0xff]   ;;  %v669_v9 = vld [vmem:[%s310_s10] sm:$0xf]  ;;  %v3433_v11 = vld [vmem:[%s3795_s30 + $0x38] sm:$0xff]  }
  0x16   : > { %3104 = vmatprep.mubr.msk.bf16.mxu0 %vm439_vm1, %v3428_v4  ;;  %v2942_v10 = vcombine.low %v669_v9, %v669_v9  ;;  %3317 = vmatprep.subr.msk.bf16.mxu1 %vm671_vm2, %v669_v9  ;;  %v3434_v12 = vld [vmem:[%s3795_s30 + $0x40] sm:$0xff]   ;;  %v3435_v13 = vld [vmem:[%s3795_s30 + $0x48] sm:$0xff]   ;;  %v3436_v14 = vld [vmem:[%s3795_s30 + $0x50] sm:$0xff]   ;;  %v721_v20 = vsel %vm671_vm2, %v669_v9, 0 }
  0x17   : > { %v3437_v15 = vld [vmem:[%s3795_s30 + $0x58] sm:$0xff]   ;;  %v3438_v16 = vld [vmem:[%s3795_s30 + $0x60] sm:$0xff]   ;;  %v3439_v17 = vld [vmem:[%s3795_s30 + $0x68] sm:$0xff]   ;;  %3133 = vmatpush3.bf16.xpose.msra.mxu1 %v721_v20 }
  0x18   : > { %1517 = vrot.lane.b32.xlu0 %v2942_v10, %s3732_s11  ;;  %v3440_v18 = vld [vmem:[%s3795_s30 + $0x70] sm:$0xff]   ;;  %v3441_v19 = vld [vmem:[%s3795_s30 + $0x78] sm:$0xff]  }
  0x1d   : > { %3105 = vmatmul.mubr.msk.bf16.gmra.mrb[4].mxu0 %vm439_vm1, %v3429_v5 }
  0x1e   : > { %3108 = vmatprep.mubr.msk.bf16.mxu0 %vm439_vm1, %v3430_v6 }
  0x25   : > { %3109 = vmatmul.mubr.msk.bf16.gmra.mrb[8].mxu0 %vm439_vm1, %v3431_v7 }
  0x26   : > { %3112 = vmatprep.mubr.msk.bf16.mxu0 %vm439_vm1, %v3432_v8 }
  0x2d   : > { %3113 = vmatmul.mubr.msk.bf16.gmra.mrb[12].mxu0 %vm439_vm1, %v3433_v11 }
  0x2e   : > { %3116 = vmatprep.mubr.msk.bf16.mxu0 %vm439_vm1, %v3434_v12 }
  0x35   : > { %3117 = vmatmul.mubr.msk.bf16.gmra.mrb[16].mxu0 %vm439_vm1, %v3435_v13 }
  0x36   : > { %3120 = vmatprep.mubr.msk.bf16.mxu0 %vm439_vm1, %v3436_v14 }
  0x3d   : > { %3121 = vmatmul.mubr.msk.bf16.gmra.mrb[20].mxu0 %vm439_vm1, %v3437_v15 }
  0x3e   : > { %3124 = vmatprep.mubr.msk.bf16.mxu0 %vm439_vm1, %v3438_v16 }
  0x45   : > { %3125 = vmatmul.mubr.msk.bf16.gmra.mrb[24].mxu0 %vm439_vm1, %v3439_v17 }
  0x46   : > { %3128 = vmatprep.mubr.msk.bf16.mxu0 %vm439_vm1, %v3440_v18 }
  0x4d   : > { %3129 = vmatmul.mubr.msk.bf16.gmra.mrb[28].mxu0 %vm439_vm1, %v3441_v19 }
  0x8a   : > { %v1518_v21 = vpop.permute.xlu0 %1517 }
  0x8b   : > { %3319 = vmatprep.subr.msk.bf16.mxu1 %vm671_vm2, %v1518_v21  ;;  %v1568_v28 = vsel %vm671_vm2, %v1518_v21, 0 }
  0xe8   : > { %v3102_v22 = vpop.f32.mrb[0].mxu0 }
  0xe9   : > { %v526_v23 = vpop.f32.mrb[1].mxu0 }
  0xea   : > { %v3103_v24 = vpop.f32.mrb[2].mxu0 }
  0xeb   : > { %v654_v25 = vpack.c.bf16 %v3103_v24, %v3102_v22  ;;  %v529_v26 = vpop.f32.mrb[3].mxu0 }
  0xec   : > { %v653_v27 = vpack.c.bf16 %v529_v26, %v526_v23 }
  0xed   : > { %1484 = vrot.lane.b32.xlu1 %v654_v25, %s3732_s11 }
  0xee   : > { %1482 = vrot.lane.b32.xlu0 %v653_v27, %s3732_s11  ;;  %3134 = vmatprep.mubr.msk.bf16.mxu1 %vm671_vm2, %v653_v27 }
  0xef   : > { %3135 = vmatmul.mubr.msk.bf16.vlgmr.msra.gmra.mrb[0].mxu1 %vm671_vm2, %v654_v25 }
  0xf0   : > { %v3106_v29 = vpop.f32.mrb[4].mxu0  ;;  %3201 = vmatpush3.bf16.xpose.msra.mxu1 %v1568_v28 }
  0xf1   : > { %v542_v30 = vpop.f32.mrb[5].mxu0 }
  0xf2   : > { %v3107_v31 = vpop.f32.mrb[6].mxu0 }
  0xf3   : > { %v656_v32 = vpack.c.bf16 %v3107_v31, %v3106_v29  ;;  %v545_v33 = vpop.f32.mrb[7].mxu0 }
  0xf4   : > { %v655_v34 = vpack.c.bf16 %v545_v33, %v542_v30 }
  0xf5   : > { %1488 = vrot.lane.b32.xlu0 %v656_v32, %s3732_s11 }
  0xf6   : > { %1486 = vrot.lane.b32.xlu1 %v655_v34, %s3732_s11  ;;  %3138 = vmatprep.mubr.msk.bf16.mxu1 %vm671_vm2, %v655_v34 }
  0xf7   : > { %3139 = vmatmul.mubr.msk.bf16.gmra.mrb[4].mxu1 %vm671_vm2, %v656_v32 }
  0xf8   : > { %v3110_v35 = vpop.f32.mrb[8].mxu0 }
  0xf9   : > { %v558_v36 = vpop.f32.mrb[9].mxu0 }
  0xfa   : > { %v3111_v37 = vpop.f32.mrb[10].mxu0 }
  0xfb   : > { %v658_v38 = vpack.c.bf16 %v3111_v37, %v3110_v35  ;;  %v561_v39 = vpop.f32.mrb[11].mxu0 }
  0xfc   : > { %v657_v40 = vpack.c.bf16 %v561_v39, %v558_v36 }
  0xfd   : > { %1492 = vrot.lane.b32.xlu0 %v658_v38, %s3732_s11 }
  0xfe   : > { %1490 = vrot.lane.b32.xlu1 %v657_v40, %s3732_s11  ;;  %3142 = vmatprep.mubr.msk.bf16.mxu1 %vm671_vm2, %v657_v40 }
  0xff   : > { %3143 = vmatmul.mubr.msk.bf16.gmra.mrb[8].mxu1 %vm671_vm2, %v658_v38 }
 0x100   : > { %v3114_v41 = vpop.f32.mrb[12].mxu0 }
 0x101   : > { %v574_v42 = vpop.f32.mrb[13].mxu0 }
 0x102   : > { %v3115_v43 = vpop.f32.mrb[14].mxu0 }
 0x103   : > { %v660_v44 = vpack.c.bf16 %v3115_v43, %v3114_v41  ;;  %v577_v45 = vpop.f32.mrb[15].mxu0 }
 0x104   : > { %v659_v46 = vpack.c.bf16 %v577_v45, %v574_v42 }
 0x105   : > { %1496 = vrot.lane.b32.xlu0 %v660_v44, %s3732_s11 }
 0x106   : > { %1494 = vrot.lane.b32.xlu1 %v659_v46, %s3732_s11  ;;  %3146 = vmatprep.mubr.msk.bf16.mxu1 %vm671_vm2, %v659_v46 }
 0x107   : > { %3147 = vmatmul.mubr.msk.bf16.gmra.mrb[12].mxu1 %vm671_vm2, %v660_v44 }
 0x108   : > { %v3118_v47 = vpop.f32.mrb[16].mxu0 }
 0x109   : > { %v590_v48 = vpop.f32.mrb[17].mxu0 }
 0x10a   : > { %v3119_v49 = vpop.f32.mrb[18].mxu0 }
 0x10b   : > { %v662_v50 = vpack.c.bf16 %v3119_v49, %v3118_v47  ;;  %v593_v51 = vpop.f32.mrb[19].mxu0 }
 0x10c   : > { %v661_v52 = vpack.c.bf16 %v593_v51, %v590_v48 }
 0x10d   : > { %1500 = vrot.lane.b32.xlu0 %v662_v50, %s3732_s11 }
 0x10e   : > { %3150 = vmatprep.mubr.msk.bf16.mxu1 %vm671_vm2, %v661_v52  ;;  %1498 = vrot.lane.b32.xlu1 %v661_v52, %s3732_s11 }
 0x10f   : > { %3151 = vmatmul.mubr.msk.bf16.gmra.mrb[16].mxu1 %vm671_vm2, %v662_v50 }
 0x110   : > { %v3122_v53 = vpop.f32.mrb[20].mxu0 }
 0x111   : > { %v606_v54 = vpop.f32.mrb[21].mxu0 }
 0x112   : > { %v3123_v55 = vpop.f32.mrb[22].mxu0 }
 0x113   : > { %v664_v56 = vpack.c.bf16 %v3123_v55, %v3122_v53  ;;  %v609_v57 = vpop.f32.mrb[23].mxu0 }
 0x114   : > { %v663_v58 = vpack.c.bf16 %v609_v57, %v606_v54 }
 0x115   : > { %1504 = vrot.lane.b32.xlu0 %v664_v56, %s3732_s11 }
 0x116   : > { %3154 = vmatprep.mubr.msk.bf16.mxu1 %vm671_vm2, %v663_v58  ;;  %1502 = vrot.lane.b32.xlu1 %v663_v58, %s3732_s11  ;;  %v3963_v58 = vld [vmem:[%s314_s14] sm:$0xf] }
 0x117   : > { %3155 = vmatmul.mubr.msk.bf16.gmra.mrb[20].mxu1 %vm671_vm2, %v664_v56  ;;  %3318 = vmatprep.subr.msk.bf16.mxu0 %vm1237_vm4, %v3963_v58 }
 0x118   : > { %v3126_v59 = vpop.f32.mrb[24].mxu0 }
 0x119   : > { %v622_v60 = vpop.f32.mrb[25].mxu0 }
 0x11a   : > { %v3127_v61 = vpop.f32.mrb[26].mxu0 }
 0x11b   : > { %v666_v62 = vpack.c.bf16 %v3127_v61, %v3126_v59  ;;  %v625_v63 = vpop.f32.mrb[27].mxu0 }
 0x11c   : > { %v665_v0 = vpack.c.bf16 %v625_v63, %v622_v60  ;;  %v1239_v60 = vsel %vm1237_vm4, %v3963_v58, 0 }
 0x11d   : > { %1508 = vrot.lane.b32.xlu0 %v666_v62, %s3732_s11  ;;  %3167 = vmatpush3.bf16.msra.mxu0 %v1239_v60 }
 0x11e   : > { %3158 = vmatprep.mubr.msk.bf16.mxu1 %vm671_vm2, %v665_v0  ;;  %1506 = vrot.lane.b32.xlu1 %v665_v0, %s3732_s11 }
 0x11f   : > { %3159 = vmatmul.mubr.msk.bf16.gmra.mrb[24].mxu1 %vm671_vm2, %v666_v62 }
 0x120   : > { %v3130_v1 = vpop.f32.mrb[28].mxu0 }
 0x121   : > { %v638_v2 = vpop.f32.mrb[29].mxu0 }
 0x122   : > { %v3131_v3 = vpop.f32.mrb[30].mxu0 }
 0x123   : > { %v668_v4 = vpack.c.bf16 %v3131_v3, %v3130_v1  ;;  %v641_v5 = vpop.f32.mrb[31].mxu0 }
 0x124   : > { %v667_v6 = vpack.c.bf16 %v641_v5, %v638_v2 }
 0x125   : > { %1512 = vrot.lane.b32.xlu0 %v668_v4, %s3732_s11 }
 0x126   : > { %3162 = vmatprep.mubr.msk.bf16.mxu1 %vm671_vm2, %v667_v6  ;;  %1510 = vrot.lane.b32.xlu1 %v667_v6, %s3732_s11 }
 0x127   : > { %3163 = vmatmul.mubr.msk.bf16.gmra.mrb[28].mxu1 %vm671_vm2, %v668_v4 }
 0x15f   : > { %v1485_v8 = vpop.permute.xlu1 %1484 }
 0x160   : > { %v1483_v7 = vpop.permute.xlu0 %1482 }
 0x161   : > { %3202 = vmatprep.mubr.msk.bf16.mxu1 %vm671_vm2, %v1483_v7 }
 0x162   : > { %3203 = vmatmul.mubr.msk.bf16.vlgmr.msra.gmra.mrb[32].mxu1 %vm671_vm2, %v1485_v8 }
 0x167   : > { %v1489_v10 = vpop.permute.xlu0 %1488 }
 0x168   : > { %v1487_v9 = vpop.permute.xlu1 %1486 }
 0x169   : > { %3206 = vmatprep.mubr.msk.bf16.mxu1 %vm671_vm2, %v1487_v9 }
 0x16a   : > { %3207 = vmatmul.mubr.msk.bf16.gmra.mrb[36].mxu1 %vm671_vm2, %v1489_v10 }
 0x16f   : > { %v1493_v12 = vpop.permute.xlu0 %1492 }
 0x170   : > { %v1491_v11 = vpop.permute.xlu1 %1490 }
 0x171   : > { %3210 = vmatprep.mubr.msk.bf16.mxu1 %vm671_vm2, %v1491_v11 }
 0x172   : > { %3211 = vmatmul.mubr.msk.bf16.gmra.mrb[40].mxu1 %vm671_vm2, %v1493_v12 }
 0x177   : > { %v1497_v14 = vpop.permute.xlu0 %1496 }
 0x178   : > { %v1495_v13 = vpop.permute.xlu1 %1494 }
 0x179   : > { %3214 = vmatprep.mubr.msk.bf16.mxu1 %vm671_vm2, %v1495_v13 }
 0x17a   : > { %3215 = vmatmul.mubr.msk.bf16.gmra.mrb[44].mxu1 %vm671_vm2, %v1497_v14 }
 0x17f   : > { %v1501_v15 = vpop.permute.xlu0 %1500 }
 0x180   : > { %v1499_v16 = vpop.permute.xlu1 %1498 }
 0x181   : > { %3218 = vmatprep.mubr.msk.bf16.mxu1 %vm671_vm2, %v1499_v16 }
 0x182   : > { %3219 = vmatmul.mubr.msk.bf16.gmra.mrb[48].mxu1 %vm671_vm2, %v1501_v15 }
 0x187   : > { %v1505_v17 = vpop.permute.xlu0 %1504 }
 0x188   : > { %v1503_v18 = vpop.permute.xlu1 %1502 }
 0x189   : > { %3222 = vmatprep.mubr.msk.bf16.mxu1 %vm671_vm2, %v1503_v18 }
 0x18a   : > { %3223 = vmatmul.mubr.msk.bf16.gmra.mrb[52].mxu1 %vm671_vm2, %v1505_v17 }
 0x18f   : > { %v1509_v19 = vpop.permute.xlu0 %1508 }
 0x190   : > { %v1507_v20 = vpop.permute.xlu1 %1506 }
 0x191   : > { %3226 = vmatprep.mubr.msk.bf16.mxu1 %vm671_vm2, %v1507_v20 }
 0x192   : > { %3227 = vmatmul.mubr.msk.bf16.gmra.mrb[56].mxu1 %vm671_vm2, %v1509_v19 }
 0x197   : > { %v1513_v21 = vpop.permute.xlu0 %1512 }
 0x198   : > { %v1511_v22 = vpop.permute.xlu1 %1510 }
 0x199   : > { %3230 = vmatprep.mubr.msk.bf16.mxu1 %vm671_vm2, %v1511_v22 }
 0x19a   : > { %3231 = vmatmul.mubr.msk.bf16.gmra.mrb[60].mxu1 %vm671_vm2, %v1513_v21 }
 0x1c2   : > { %v3888_v23 = vpop.f32.mrb[0].mxu1 }
 0x1c3   : > { %v3890_v24 = vpop.f32.mrb[1].mxu1  ;;  %v891_v25 = vsel %vm884_vm3, %v3888_v23, -inf }
 0x1c4   : > { %v3894_v26 = vpop.f32.mrb[2].mxu1  ;;  %892 = vmax.xlane.f32.xlu0 %v891_v25  ;;  %v885_v27 = vsel %vm884_vm3, %v3890_v24, -inf }
 0x1c5   : > { %v3898_v28 = vpop.f32.mrb[3].mxu1  ;;  %886 = vmax.xlane.f32.xlu1 %v885_v27  ;;  %v894_v30 = vsel %vm884_vm3, %v3894_v26, -inf }
 0x1c6   : > { %v888_v29 = vsel %vm884_vm3, %v3898_v28, -inf }
 0x1c8   : > { %889 = vmax.xlane.f32.xlu0 %v888_v29 }
 0x1c9   : > { %895 = vmax.xlane.f32.xlu1 %v894_v30 }
 0x1ca   : > { %v3904_v31 = vpop.f32.mrb[4].mxu1 }
 0x1cb   : > { %v3906_v32 = vpop.f32.mrb[5].mxu1  ;;  %v903_v33 = vsel %vm884_vm3, %v3904_v31, -inf }
 0x1cc   : > { %v3910_v34 = vpop.f32.mrb[6].mxu1  ;;  %904 = vmax.xlane.f32.xlu0 %v903_v33  ;;  %v897_v37 = vsel %vm884_vm3, %v3906_v32, -inf }
 0x1cd   : > { %v3912_v35 = vpop.f32.mrb[7].mxu1  ;;  %v906_v36 = vsel %vm884_vm3, %v3910_v34, -inf }
 0x1ce   : > { %907 = vmax.xlane.f32.xlu1 %v906_v36  ;;  %v900_v38 = vsel %vm884_vm3, %v3912_v35, -inf }
 0x1d0   : > { %898 = vmax.xlane.f32.xlu0 %v897_v37 }
 0x1d2   : > { %v3920_v39 = vpop.f32.mrb[8].mxu1  ;;  %901 = vmax.xlane.f32.xlu1 %v900_v38 }
 0x1d3   : > { %v3922_v40 = vpop.f32.mrb[9].mxu1  ;;  %v915_v41 = vsel %vm884_vm3, %v3920_v39, -inf }
 0x1d4   : > { %v3926_v42 = vpop.f32.mrb[10].mxu1  ;;  %916 = vmax.xlane.f32.xlu0 %v915_v41  ;;  %v909_v45 = vsel %vm884_vm3, %v3922_v40, -inf }
 0x1d5   : > { %v3928_v43 = vpop.f32.mrb[11].mxu1  ;;  %v918_v44 = vsel %vm884_vm3, %v3926_v42, -inf }
 0x1d6   : > { %919 = vmax.xlane.f32.xlu1 %v918_v44  ;;  %v912_v46 = vsel %vm884_vm3, %v3928_v43, -inf }
 0x1d8   : > { %910 = vmax.xlane.f32.xlu0 %v909_v45 }
 0x1da   : > { %v3936_v47 = vpop.f32.mrb[12].mxu1  ;;  %913 = vmax.xlane.f32.xlu1 %v912_v46 }
 0x1db   : > { %v3938_v48 = vpop.f32.mrb[13].mxu1  ;;  %v927_v49 = vsel %vm884_vm3, %v3936_v47, -inf }
 0x1dc   : > { %v3942_v50 = vpop.f32.mrb[14].mxu1  ;;  %928 = vmax.xlane.f32.xlu0 %v927_v49  ;;  %v921_v53 = vsel %vm884_vm3, %v3938_v48, -inf }
 0x1dd   : > { %v3944_v51 = vpop.f32.mrb[15].mxu1  ;;  %v930_v52 = vsel %vm884_vm3, %v3942_v50, -inf }
 0x1de   : > { %931 = vmax.xlane.f32.xlu1 %v930_v52  ;;  %v924_v54 = vsel %vm884_vm3, %v3944_v51, -inf }
 0x1e0   : > { %922 = vmax.xlane.f32.xlu0 %v921_v53 }
 0x1e2   : > { %v3952_v55 = vpop.f32.mrb[16].mxu1  ;;  %925 = vmax.xlane.f32.xlu1 %v924_v54 }
 0x1e3   : > { %v3959_v56 = vpop.f32.mrb[17].mxu1  ;;  %v939_v57 = vsel %vm884_vm3, %v3952_v55, -inf }
 0x1e4   : > { %v3965_v59 = vpop.f32.mrb[18].mxu1  ;;  %940 = vmax.xlane.f32.xlu0 %v939_v57  ;;  %v933_v63 = vsel %vm884_vm3, %v3959_v56, -inf }
 0x1e5   : > { %v942_v61 = vsel %vm884_vm3, %v3965_v59, -inf  ;;  %v3973_v62 = vpop.f32.mrb[19].mxu1 }
 0x1e6   : > { %943 = vmax.xlane.f32.xlu1 %v942_v61  ;;  %v936_v0 = vsel %vm884_vm3, %v3973_v62, -inf }
 0x1e8   : > { %934 = vmax.xlane.f32.xlu0 %v933_v63 }
 0x1ea   : > { %v3979_v1 = vpop.f32.mrb[20].mxu1  ;;  %937 = vmax.xlane.f32.xlu1 %v936_v0 }
 0x1eb   : > { %v3981_v2 = vpop.f32.mrb[21].mxu1  ;;  %v951_v3 = vsel %vm884_vm3, %v3979_v1, -inf }
 0x1ec   : > { %v3985_v4 = vpop.f32.mrb[22].mxu1  ;;  %952 = vmax.xlane.f32.xlu0 %v951_v3  ;;  %v945_v7 = vsel %vm884_vm3, %v3981_v2, -inf }
 0x1ed   : > { %v954_v5 = vsel %vm884_vm3, %v3985_v4, -inf  ;;  %v3989_v6 = vpop.f32.mrb[23].mxu1 }
 0x1ee   : > { %955 = vmax.xlane.f32.xlu1 %v954_v5  ;;  %v948_v8 = vsel %vm884_vm3, %v3989_v6, -inf }
 0x1f0   : > { %946 = vmax.xlane.f32.xlu0 %v945_v7 }
 0x1f2   : > { %v3995_v9 = vpop.f32.mrb[24].mxu1  ;;  %949 = vmax.xlane.f32.xlu1 %v948_v8 }
 0x1f3   : > { %v3997_v10 = vpop.f32.mrb[25].mxu1  ;;  %v963_v11 = vsel %vm884_vm3, %v3995_v9, -inf }
 0x1f4   : > { %v4001_v12 = vpop.f32.mrb[26].mxu1  ;;  %964 = vmax.xlane.f32.xlu0 %v963_v11  ;;  %v957_v15 = vsel %vm884_vm3, %v3997_v10, -inf }
 0x1f5   : > { %v966_v13 = vsel %vm884_vm3, %v4001_v12, -inf  ;;  %v4005_v14 = vpop.f32.mrb[27].mxu1 }
 0x1f6   : > { %967 = vmax.xlane.f32.xlu1 %v966_v13  ;;  %v960_v16 = vsel %vm884_vm3, %v4005_v14, -inf }
 0x1f8   : > { %958 = vmax.xlane.f32.xlu0 %v957_v15 }
 0x1fa   : > { %961 = vmax.xlane.f32.xlu1 %v960_v16  ;;  %v4011_v17 = vpop.f32.mrb[28].mxu1 }
 0x1fb   : > { %v4013_v18 = vpop.f32.mrb[29].mxu1  ;;  %v975_v19 = vsel %vm884_vm3, %v4011_v17, -inf }
 0x1fc   : > { %976 = vmax.xlane.f32.xlu0 %v975_v19  ;;  %v4017_v20 = vpop.f32.mrb[30].mxu1  ;;  %v969_v22 = vsel %vm884_vm3, %v4013_v18, -inf }
 0x1fd   : > { %v978_v21 = vsel %vm884_vm3, %v4017_v20, -inf  ;;  %v4023_v25 = vpop.f32.mrb[31].mxu1 }
 0x1fe   : > { %979 = vmax.xlane.f32.xlu1 %v978_v21  ;;  %v972_v27 = vsel %vm884_vm3, %v4023_v25, -inf }
 0x200   : > { %970 = vmax.xlane.f32.xlu0 %v969_v22 }
 0x202   : > { %973 = vmax.xlane.f32.xlu1 %v972_v27 }
 0x235   : > { %v4027_v29 = vpop.f32.mrb[32].mxu1 }
 0x236   : > { %v4029_v30 = vpop.f32.mrb[33].mxu1  ;;  %v1737_v33 = vsel %vm884_vm3, %v4027_v29, -inf }
 0x237   : > { %1738 = vmax.xlane.f32.xlu0 %v1737_v33  ;;  %v4033_v36 = vpop.f32.mrb[34].mxu1  ;;  %v1731_v41 = vsel %vm884_vm3, %v4029_v30, -inf }
 0x238   : > { %v4035_v37 = vpop.f32.mrb[35].mxu1  ;;  %v1740_v38 = vsel %vm884_vm3, %v4033_v36, -inf }
 0x239   : > { %1741 = vmax.xlane.f32.xlu1 %v1740_v38  ;;  %v1734_v44 = vsel %vm884_vm3, %v4035_v37, -inf }
 0x23b   : > { %1732 = vmax.xlane.f32.xlu0 %v1731_v41 }
 0x23d   : > { %v4043_v45 = vpop.f32.mrb[36].mxu1  ;;  %1735 = vmax.xlane.f32.xlu1 %v1734_v44 }
 0x23e   : > { %v4045_v46 = vpop.f32.mrb[37].mxu1  ;;  %v1749_v49 = vsel %vm884_vm3, %v4043_v45, -inf }
 0x23f   : > { %1750 = vmax.xlane.f32.xlu0 %v1749_v49  ;;  %v4049_v52 = vpop.f32.mrb[38].mxu1  ;;  %v1743_v57 = vsel %vm884_vm3, %v4045_v46, -inf }
 0x240   : > { %v4051_v53 = vpop.f32.mrb[39].mxu1  ;;  %v1752_v54 = vsel %vm884_vm3, %v4049_v52, -inf }
 0x241   : > { %1753 = vmax.xlane.f32.xlu1 %v1752_v54  ;;  %v1746_v60 = vsel %vm884_vm3, %v4051_v53, -inf }
 0x243   : > { %1744 = vmax.xlane.f32.xlu0 %v1743_v57 }
 0x245   : > { %v4059_v61 = vpop.f32.mrb[40].mxu1  ;;  %1747 = vmax.xlane.f32.xlu1 %v1746_v60 }
 0x246   : > { %v4061_v63 = vpop.f32.mrb[41].mxu1  ;;  %v1761_v0 = vsel %vm884_vm3, %v4059_v61, -inf }
 0x247   : > { %1762 = vmax.xlane.f32.xlu0 %v1761_v0  ;;  %v4065_v3 = vpop.f32.mrb[42].mxu1  ;;  %v1755_v8 = vsel %vm884_vm3, %v4061_v63, -inf }
 0x248   : > { %v4067_v5 = vpop.f32.mrb[43].mxu1  ;;  %v1764_v7 = vsel %vm884_vm3, %v4065_v3, -inf }
 0x249   : > { %1765 = vmax.xlane.f32.xlu1 %v1764_v7  ;;  %v1758_v11 = vsel %vm884_vm3, %v4067_v5, -inf }
 0x24b   : > { %1756 = vmax.xlane.f32.xlu0 %v1755_v8 }
 0x24d   : > { %v4075_v13 = vpop.f32.mrb[44].mxu1  ;;  %1759 = vmax.xlane.f32.xlu1 %v1758_v11 }
 0x24e   : > { %v4077_v15 = vpop.f32.mrb[45].mxu1  ;;  %v1773_v16 = vsel %vm884_vm3, %v4075_v13, -inf }
 0x24f   : > { %1774 = vmax.xlane.f32.xlu0 %v1773_v16  ;;  %v4081_v19 = vpop.f32.mrb[46].mxu1  ;;  %v1767_v41 = vsel %vm884_vm3, %v4077_v15, -inf }
 0x250   : > { %v4083_v21 = vpop.f32.mrb[47].mxu1  ;;  %v1776_v22 = vsel %vm884_vm3, %v4081_v19, -inf }
 0x251   : > { %v893_v27 = vpop.xlane.xlu0 %892  ;;  %1777 = vmax.xlane.f32.xlu1 %v1776_v22  ;;  %v1770_v54 = vsel %vm884_vm3, %v4083_v21, -inf }
 0x252   : > { %v983_v33 = vsub.f32 %v3888_v23, %v893_v27  ;;  %v887_v38 = vpop.xlane.xlu1 %886 }
 0x253   : > { %v981_v44 = vsub.f32 %v3890_v24, %v887_v38  ;;  %1768 = vmax.xlane.f32.xlu0 %v1767_v41 }
 0x254   : > { %v1017_v49 = vmul.f32 1.442695, %v983_v33 }
 0x255   : > { %v1013_v57 = vmul.f32 1.442695, %v981_v44  ;;  %v890_v60 = vpop.xlane.xlu0 %889  ;;  %1771 = vmax.xlane.f32.xlu1 %v1770_v54  ;;  %v4093_v0 = vpop.f32.mrb[48].mxu1 }
 0x256   : > { %4751 = vst [vmem:[#allocation2_spill] sm:$0xff] %v4093_v0  ;;  %v982_v7 = vsub.f32 %v3898_v28, %v890_v60  ;;  %v896_v8 = vpop.xlane.xlu1 %895  ;;  %v1785_v23 = vsel %vm884_vm3, %v4093_v0, -inf  ;;  %v4098_v11 = vpop.f32.mrb[49].mxu1  ;;  %3452 = vpow2.f32 %v1017_v49 }
 0x257   : > { %4752 = vst [vmem:[#allocation3_spill] sm:$0xff] %v4098_v11  ;;  %v984_v24 = vsub.f32 %v3894_v26, %v896_v8  ;;  %v4101_v16 = vpop.f32.mrb[50].mxu1  ;;  %3454 = vpow2.f32 %v1013_v57  ;;  %v1779_v41 = vsel %vm884_vm3, %v4098_v11, -inf }
 0x258   : > { %4753 = vst [vmem:[#allocation4_spill] sm:$0xff] %v4101_v16  ;;  %v1015_v22 = vmul.f32 1.442695, %v982_v7  ;;  %v4103_v27 = vpop.f32.mrb[51].mxu1  ;;  %v1788_v8 = vsel %vm884_vm3, %v4101_v16, -inf }
 0x259   : > { %4754 = vst [vmem:[#allocation5_spill] sm:$0xff] %v4103_v27  ;;  %v1019_v33 = vmul.f32 1.442695, %v984_v24  ;;  %v905_v38 = vpop.xlane.xlu0 %904  ;;  %1786 = vmax.xlane.f32.xlu1 %v1785_v23 }
 0x25a   : > { %3456 = vpow2.f32 %v1015_v22  ;;  %v987_v28 = vsub.f32 %v3904_v31, %v905_v38 }
 0x25b   : > { %3458 = vpow2.f32 %v1019_v33  ;;  %v908_v44 = vpop.xlane.xlu1 %907 }
 0x25c   : > { %v1025_v54 = vmul.f32 1.442695, %v987_v28  ;;  %v988_v26 = vsub.f32 %v3910_v34, %v908_v44  ;;  %v1782_v44 = vsel %vm884_vm3, %v4103_v27, -inf }
 0x25d   : > { %v899_v60 = vpop.xlane.xlu0 %898  ;;  %1780 = vmax.xlane.f32.xlu1 %v1779_v41  ;;  %v4109_v49 = vpop.f32.mrb[52].mxu1 }
 0x25e   : > { %v1027_v7 = vmul.f32 1.442695, %v988_v26  ;;  %v985_v57 = vsub.f32 %v3906_v32, %v899_v60  ;;  %v4114_v23 = vpop.f32.mrb[53].mxu1  ;;  %3460 = vpow2.f32 %v1025_v54 }
 0x25f   : > { %4755 = vst [vmem:[#allocation6_spill] sm:$0xff] %v4114_v23  ;;  %v902_v31 = vpop.xlane.xlu1 %901  ;;  %v4116_v24 = vpop.f32.mrb[54].mxu1 }
 0x260   : > { %4756 = vst [vmem:[#allocation7_spill] sm:$0xff] %v4116_v24  ;;  %3462 = vpow2.f32 %v1027_v7  ;;  %v1021_v22 = vmul.f32 1.442695, %v985_v57  ;;  %v986_v34 = vsub.f32 %v3912_v35, %v902_v31  ;;  %v4119_v33 = vpop.f32.mrb[55].mxu1  ;;  %v4121_v28 = vpop.eup %3452  ;;  %v2959_v31 = vcombine.low %v3963_v58, %v3963_v58 }
 0x261   : > { %4757 = vst [vmem:[#allocation8_spill] sm:$0xff] %v4119_v33  ;;  %v917_v38 = vpop.xlane.xlu0 %916  ;;  %1789 = vmax.xlane.f32.xlu1 %v1788_v8  ;;  %v4126_v54 = vpop.eup %3454 }
 0x262   : > { %v1023_v32 = vmul.f32 1.442695, %v986_v34  ;;  %v991_v41 = vsub.f32 %v3920_v39, %v917_v38  ;;  %3464 = vpow2.f32 %v1021_v22 }
 0x263   : > { %v920_v26 = vpop.xlane.xlu1 %919 }
 0x264   : > { %v4128_v60 = vpop.eup %3456  ;;  %3466 = vpow2.f32 %v1023_v32  ;;  %v1033_v35 = vmul.f32 1.442695, %v991_v41  ;;  %v992_v7 = vsub.f32 %v3926_v42, %v920_v26  ;;  %v1791_v42 = vsel %vm884_vm3, %v4114_v23, -inf }
 0x265   : > { %v4131_v57 = vpop.eup %3458  ;;  %v911_v8 = vpop.xlane.xlu0 %910  ;;  %1783 = vmax.xlane.f32.xlu1 %v1782_v44  ;;  %v1173_v39 = vpack.c.bf16 %v4128_v60, %v4126_v54 }
 0x266   : > { %v4137_v34 = vpop.f32.mrb[56].mxu1  ;;  %v1174_v22 = vpack.c.bf16 %v4131_v57, %v4121_v28  ;;  %v1035_v38 = vmul.f32 1.442695, %v992_v7  ;;  %v989_v32 = vsub.f32 %v3922_v40, %v911_v8  ;;  %3468 = vpow2.f32 %v1033_v35 }
 0x267   : > { %v4144_v41 = vpop.f32.mrb[57].mxu1  ;;  %3168 = vmatprep.mubr.msk.bf16.mxu0 %vm884_vm3, %v1173_v39  ;;  %v914_v44 = vpop.xlane.xlu1 %913 }
 0x268   : > { %v4147_v26 = vpop.f32.mrb[58].mxu1  ;;  %3470 = vpow2.f32 %v1035_v38  ;;  %v1029_v58 = vmul.f32 1.442695, %v989_v32  ;;  %v990_v27 = vsub.f32 %v3928_v43, %v914_v44  ;;  %3169 = vmatmul.mubr.msk.bf16.vlgmr.msra.gmra.mrb[32].mxu0 %vm884_vm3, %v1174_v22  ;;  %v4153_v40 = vpop.eup %3460  ;;  %v1800_v38 = vsel %vm884_vm3, %v4116_v24, -inf }
 0x269   : > { %v4151_v7 = vpop.f32.mrb[59].mxu1  ;;  %v929_v8 = vpop.xlane.xlu0 %928  ;;  %2038 = vrot.lane.b32.xlu0 %v2959_v31, %s3732_s11  ;;  %1792 = vmax.xlane.f32.xlu1 %v1791_v42 }
 0x26a   : > { %v4156_v35 = vpop.eup %3462  ;;  %v1031_v39 = vmul.f32 1.442695, %v990_v27  ;;  %v995_v23 = vsub.f32 %v3936_v47, %v929_v8  ;;  %3472 = vpow2.f32 %v1029_v58  ;;  %v1794_v58 = vsel %vm884_vm3, %v4119_v33, -inf }
 0x26b   : > { %v932_v43 = vpop.xlane.xlu1 %931  ;;  %v1176_v22 = vpack.c.bf16 %v4156_v35, %v4153_v40 }
 0x26c   : > { %3474 = vpow2.f32 %v1031_v39  ;;  %v1041_v32 = vmul.f32 1.442695, %v995_v23  ;;  %v996_v44 = vsub.f32 %v3942_v50, %v932_v43  ;;  %v4164_v16 = vpop.eup %3464 }
 0x26d   : > { %v923_v31 = vpop.xlane.xlu0 %922  ;;  %1801 = vmax.xlane.f32.xlu1 %v1800_v38  ;;  %v4166_v42 = vpop.f32.mrb[60].mxu1 }
 0x26e   : > { %v4168_v27 = vpop.eup %3466  ;;  %v1043_v47 = vmul.f32 1.442695, %v996_v44  ;;  %v993_v8 = vsub.f32 %v3938_v48, %v923_v31  ;;  %v4173_v24 = vpop.f32.mrb[61].mxu1  ;;  %3476 = vpow2.f32 %v1041_v32 }
 0x26f   : > { %v926_v23 = vpop.xlane.xlu1 %925  ;;  %v1175_v50 = vpack.c.bf16 %v4168_v27, %v4164_v16  ;;  %v4177_v39 = vpop.f32.mrb[62].mxu1 }
 0x270   : > { %3478 = vpow2.f32 %v1043_v47  ;;  %v1037_v38 = vmul.f32 1.442695, %v993_v8  ;;  %v994_v43 = vsub.f32 %v3944_v51, %v926_v23  ;;  %v4180_v11 = vpop.f32.mrb[63].mxu1  ;;  %v4182_v44 = vpop.eup %3468  ;;  %v1809_v47 = vsel %vm884_vm3, %v4137_v34, -inf }
 0x271   : > { %4758 = vst [vmem:[#allocation9_spill] sm:$0xff] %v4180_v11  ;;  %v941_v48 = vpop.xlane.xlu0 %940  ;;  %3172 = vmatprep.mubr.msk.bf16.mxu0 %vm884_vm3, %v1175_v50  ;;  %1795 = vmax.xlane.f32.xlu1 %v1794_v58 }
 0x272   : > { %v4185_v31 = vpop.eup %3470  ;;  %v1039_v32 = vmul.f32 1.442695, %v994_v43  ;;  %v999_v33 = vsub.f32 %v3952_v55, %v941_v48  ;;  %3173 = vmatmul.mubr.msk.bf16.gmra.mrb[36].mxu0 %vm884_vm3, %v1176_v22  ;;  %3480 = vpow2.f32 %v1037_v38  ;;  %v1803_v38 = vsel %vm884_vm3, %v4144_v41, -inf }
 0x273   : > { %v944_v51 = vpop.xlane.xlu1 %943  ;;  %v1178_v8 = vpack.c.bf16 %v4185_v31, %v4182_v44 }
 0x274   : > { %3482 = vpow2.f32 %v1039_v32  ;;  %v1049_v23 = vmul.f32 1.442695, %v999_v33  ;;  %v1000_v50 = vsub.f32 %v3965_v59, %v944_v51  ;;  %v4194_v58 = vpop.eup %3472 }
 0x275   : > { %v935_v0 = vpop.xlane.xlu0 %934  ;;  %1810 = vmax.xlane.f32.xlu1 %v1809_v47 }
 0x276   : > { %v4196_v43 = vpop.eup %3474  ;;  %v1051_v55 = vmul.f32 1.442695, %v1000_v50  ;;  %v997_v22 = vsub.f32 %v3959_v56, %v935_v0  ;;  %3484 = vpow2.f32 %v1049_v23  ;;  %v1812_v23 = vsel %vm884_vm3, %v4147_v26, -inf }
 0x277   : > { %v938_v48 = vpop.xlane.xlu1 %937  ;;  %v1177_v32 = vpack.c.bf16 %v4196_v43, %v4194_v58 }
 0x278   : > { %3486 = vpow2.f32 %v1051_v55  ;;  %v1045_v33 = vmul.f32 1.442695, %v997_v22  ;;  %v998_v59 = vsub.f32 %v3973_v62, %v938_v48  ;;  %v4204_v51 = vpop.eup %3476 }
 0x279   : > { %v953_v47 = vpop.xlane.xlu0 %952  ;;  %3176 = vmatprep.mubr.msk.bf16.mxu0 %vm884_vm3, %v1177_v32  ;;  %1804 = vmax.xlane.f32.xlu1 %v1803_v38 }
 0x27a   : > { %v4207_v50 = vpop.eup %3478  ;;  %v1047_v56 = vmul.f32 1.442695, %v998_v59  ;;  %v1003_v0 = vsub.f32 %v3979_v1, %v953_v47  ;;  %3177 = vmatmul.mubr.msk.bf16.gmra.mrb[40].mxu0 %vm884_vm3, %v1178_v8  ;;  %3488 = vpow2.f32 %v1045_v33  ;;  %v1806_v33 = vsel %vm884_vm3, %v4151_v7, -inf }
 0x27b   : > { %v956_v55 = vpop.xlane.xlu1 %955  ;;  %v1180_v62 = vpack.c.bf16 %v4207_v50, %v4204_v51 }
 0x27c   : > { %3490 = vpow2.f32 %v1047_v56  ;;  %v1057_v22 = vmul.f32 1.442695, %v1003_v0  ;;  %v1004_v48 = vsub.f32 %v3985_v4, %v956_v55  ;;  %v4216_v38 = vpop.eup %3480 }
 0x27d   : > { %v947_v32 = vpop.xlane.xlu0 %946  ;;  %1813 = vmax.xlane.f32.xlu1 %v1812_v23 }
 0x27e   : > { %v4218_v59 = vpop.eup %3482  ;;  %v1059_v1 = vmul.f32 1.442695, %v1004_v48  ;;  %v1001_v8 = vsub.f32 %v3981_v2, %v947_v32  ;;  %3492 = vpow2.f32 %v1057_v22  ;;  %v1815_v22 = vsel %vm884_vm3, %v4173_v24, -inf }
 0x27f   : > { %v950_v47 = vpop.xlane.xlu1 %949  ;;  %v1179_v56 = vpack.c.bf16 %v4218_v59, %v4216_v38 }
 0x280   : > { %3494 = vpow2.f32 %v1059_v1  ;;  %v1053_v0 = vmul.f32 1.442695, %v1001_v8  ;;  %v1002_v4 = vsub.f32 %v3989_v6, %v950_v47  ;;  %v4226_v55 = vpop.eup %3484 }
 0x281   : > { %v965_v23 = vpop.xlane.xlu0 %964  ;;  %3180 = vmatprep.mubr.msk.bf16.mxu0 %vm884_vm3, %v1179_v56  ;;  %1807 = vmax.xlane.f32.xlu1 %v1806_v33 }
 0x282   : > { %v4229_v48 = vpop.eup %3486  ;;  %v1055_v2 = vmul.f32 1.442695, %v1002_v4  ;;  %v1007_v32 = vsub.f32 %v3995_v9, %v965_v23  ;;  %3181 = vmatmul.mubr.msk.bf16.gmra.mrb[44].mxu0 %vm884_vm3, %v1180_v62  ;;  %3496 = vpow2.f32 %v1053_v0  ;;  %v1797_v9 = vsel %vm884_vm3, %v4109_v49, -inf }
 0x283   : > { %v968_v1 = vpop.xlane.xlu1 %967  ;;  %v1182_v6 = vpack.c.bf16 %v4229_v48, %v4226_v55  ;;  %v1818_v23 = vsel %vm884_vm3, %v4180_v11, -inf }
 0x284   : > { %3498 = vpow2.f32 %v1055_v2  ;;  %v1065_v8 = vmul.f32 1.442695, %v1007_v32  ;;  %v1008_v47 = vsub.f32 %v4001_v12, %v968_v1  ;;  %v4238_v33 = vpop.eup %3488 }
 0x285   : > { %v959_v56 = vpop.xlane.xlu0 %958  ;;  %1816 = vmax.xlane.f32.xlu1 %v1815_v22 }
 0x286   : > { %v4242_v62 = vpop.eup %3490  ;;  %v1067_v4 = vmul.f32 1.442695, %v1008_v47  ;;  %v1005_v0 = vsub.f32 %v3997_v10, %v959_v56  ;;  %3500 = vpow2.f32 %v1065_v8  ;;  %v1821_v10 = vsel %vm884_vm3, %v4166_v42, -inf }
 0x287   : > { %v962_v2 = vpop.xlane.xlu1 %961  ;;  %v1181_v12 = vpack.c.bf16 %v4242_v62, %v4238_v33 }
 0x288   : > { %3502 = vpow2.f32 %v1067_v4  ;;  %v1061_v32 = vmul.f32 1.442695, %v1005_v0  ;;  %v1006_v22 = vsub.f32 %v4005_v14, %v962_v2  ;;  %1798 = vmax.xlane.f32.xlu0 %v1797_v9  ;;  %v4250_v1 = vpop.eup %3492  ;;  %v1824_v14 = vsel %vm884_vm3, %v4177_v39, -inf }
 0x289   : > { %3184 = vmatprep.mubr.msk.bf16.mxu0 %vm884_vm3, %v1181_v12  ;;  %v977_v47 = vpop.xlane.xlu0 %976  ;;  %1819 = vmax.xlane.f32.xlu1 %v1818_v23 }
 0x28a   : > { %v4255_v56 = vpop.eup %3494  ;;  %v1063_v8 = vmul.f32 1.442695, %v1006_v22  ;;  %v1011_v11 = vsub.f32 %v4011_v17, %v977_v47  ;;  %3185 = vmatmul.mubr.msk.bf16.gmra.mrb[48].mxu0 %vm884_vm3, %v1182_v6  ;;  %3504 = vpow2.f32 %v1061_v32  ;;  %v1077_v47 = vsel %vm884_vm3, %v4126_v54, 0.0 }
 0x28b   : > { %v980_v9 = vpop.xlane.xlu1 %979  ;;  %v1184_v4 = vpack.c.bf16 %v4255_v56, %v4250_v1  ;;  %v1083_v54 = vsel %vm884_vm3, %v4121_v28, 0.0 }
 0x28c   : > { %3506 = vpow2.f32 %v1063_v8  ;;  %v1073_v0 = vmul.f32 1.442695, %v1011_v11  ;;  %v1012_v23 = vsub.f32 %v4017_v20, %v980_v9  ;;  %1822 = vmax.xlane.f32.xlu0 %v1821_v10  ;;  %v4264_v2 = vpop.eup %3496  ;;  %v1080_v8 = vsel %vm884_vm3, %v4128_v60, 0.0 }
 0x28d   : > { %v971_v12 = vpop.xlane.xlu0 %970  ;;  %1825 = vmax.xlane.f32.xlu1 %v1824_v14  ;;  %v1086_v60 = vsel %vm884_vm3, %v4131_v57, 0.0  ;;  %v1095_v57 = vsel %vm884_vm3, %v4153_v40, 0.0  ;;  %v1101_v40 = vsel %vm884_vm3, %v4194_v58, 0.0  ;;  %v1116_v58 = vsel %vm884_vm3, %v4218_v59, 0.0 }
 0x28e   : > { %v4266_v17 = vpop.eup %3498  ;;  %v1075_v6 = vmul.f32 1.442695, %v1012_v23  ;;  %v1009_v22 = vsub.f32 %v4013_v18, %v971_v12  ;;  %3508 = vpow2.f32 %v1073_v0  ;;  %v1089_v12 = vsel %vm884_vm3, %v4164_v16, 0.0 }
 0x28f   : > { %v974_v32 = vpop.xlane.xlu1 %973  ;;  %v1183_v11 = vpack.c.bf16 %v4266_v17, %v4264_v2  ;;  %v1143_v59 = vsel %vm884_vm3, %v4250_v1, 0.0 }
 0x290   : > { %3510 = vpow2.f32 %v1075_v6  ;;  %v1069_v20 = vmul.f32 1.442695, %v1009_v22  ;;  %v1010_v10 = vsub.f32 %v4023_v25, %v974_v32  ;;  %1078 = vadd.xlane.f32.xlu0 %v1077_v47  ;;  %v4276_v14 = vpop.eup %3500  ;;  %v1098_v32 = vsel %vm884_vm3, %v4156_v35, 0.0 }
 0x291   : > { %3188 = vmatprep.mubr.msk.bf16.mxu0 %vm884_vm3, %v1183_v11  ;;  %1081 = vadd.xlane.f32.xlu1 %v1080_v8  ;;  %v1107_v11 = vsel %vm884_vm3, %v4182_v44, 0.0  ;;  %v1104_v35 = vsel %vm884_vm3, %v4196_v43, 0.0  ;;  %v1119_v44 = vsel %vm884_vm3, %v4204_v51, 0.0  ;;  %v1113_v8 = vsel %vm884_vm3, %v4216_v38, 0.0 }
 0x292   : > { %v4279_v18 = vpop.eup %3502  ;;  %v1071_v9 = vmul.f32 1.442695, %v1010_v10  ;;  %3189 = vmatmul.mubr.msk.bf16.gmra.mrb[52].mxu0 %vm884_vm3, %v1184_v4  ;;  %3512 = vpow2.f32 %v1069_v20  ;;  %v1092_v4 = vsel %vm884_vm3, %v4168_v27, 0.0  ;;  %v1110_v10 = vsel %vm884_vm3, %v4185_v31, 0.0 }
 0x293   : > { %v1186_v25 = vpack.c.bf16 %v4279_v18, %v4276_v14  ;;  %v1122_v31 = vsel %vm884_vm3, %v4207_v50, 0.0  ;;  %v1131_v43 = vsel %vm884_vm3, %v4226_v55, 0.0  ;;  %v1125_v51 = vsel %vm884_vm3, %v4238_v33, 0.0 }
 0x294   : > { %3514 = vpow2.f32 %v1071_v9  ;;  %1084 = vadd.xlane.f32.xlu0 %v1083_v54  ;;  %v3505_v0 = vpop.eup %3504  ;;  %v1128_v50 = vsel %vm884_vm3, %v4242_v62, 0.0  ;;  %v1134_v38 = vsel %vm884_vm3, %v4229_v48, 0.0  ;;  %v1137_v55 = vsel %vm884_vm3, %v4264_v2, 0.0 }
 0x295   : > { %1087 = vadd.xlane.f32.xlu1 %v1086_v60  ;;  %v1140_v33 = vsel %vm884_vm3, %v4266_v17, 0.0  ;;  %v1146_v62 = vsel %vm884_vm3, %v4255_v56, 0.0  ;;  %v1155_v48 = vsel %vm884_vm3, %v4276_v14, 0.0  ;;  %v1149_v9 = vsel %vm884_vm3, %v3505_v0, 0.0 }
 0x296   : > { %v3507_v23 = vpop.eup %3506  ;;  %v1158_v2 = vsel %vm884_vm3, %v4279_v18, 0.0 }
 0x297   : > { %v1185_v6 = vpack.c.bf16 %v3507_v23, %v3505_v0  ;;  %v1152_v1 = vsel %vm884_vm3, %v3507_v23, 0.0 }
 0x298   : > { %1090 = vadd.xlane.f32.xlu0 %v1089_v12  ;;  %v4292_v28 = vpop.eup %3508 }
 0x299   : > { %3192 = vmatprep.mubr.msk.bf16.mxu0 %vm884_vm3, %v1185_v6  ;;  %1093 = vadd.xlane.f32.xlu1 %v1092_v4 }
 0x29a   : > { %v4295_v22 = vpop.eup %3510  ;;  %3193 = vmatmul.mubr.msk.bf16.gmra.mrb[56].mxu0 %vm884_vm3, %v1186_v25 }
 0x29b   : > { %v1188_v16 = vpack.c.bf16 %v4295_v22, %v4292_v28 }
 0x29c   : > { %1096 = vadd.xlane.f32.xlu0 %v1095_v57  ;;  %v3513_v27 = vpop.eup %3512 }
 0x29d   : > { %1099 = vadd.xlane.f32.xlu1 %v1098_v32  ;;  %v1161_v0 = vsel %vm884_vm3, %v3513_v27, 0.0 }
 0x29e   : > { %v3515_v47 = vpop.eup %3514 }
 0x29f   : > { %v1187_v20 = vpack.c.bf16 %v3515_v47, %v3513_v27  ;;  %v1164_v14 = vsel %vm884_vm3, %v3515_v47, 0.0 }
 0x2a0   : > { %1108 = vadd.xlane.f32.xlu0 %v1107_v11 }
 0x2a1   : > { %1111 = vadd.xlane.f32.xlu1 %v1110_v10  ;;  %3196 = vmatprep.mubr.msk.bf16.mxu0 %vm884_vm3, %v1187_v20 }
 0x2a2   : > { %3197 = vmatmul.mubr.msk.bf16.gmra.mrb[60].mxu0 %vm884_vm3, %v1188_v16 }
 0x2a4   : > { %1102 = vadd.xlane.f32.xlu0 %v1101_v40 }
 0x2a5   : > { %1105 = vadd.xlane.f32.xlu1 %v1104_v35 }
 0x2a8   : > { %1120 = vadd.xlane.f32.xlu0 %v1119_v44 }
 0x2a9   : > { %1123 = vadd.xlane.f32.xlu1 %v1122_v31 }
 0x2ac   : > { %1114 = vadd.xlane.f32.xlu0 %v1113_v8 }
 0x2ad   : > { %1117 = vadd.xlane.f32.xlu1 %v1116_v58 }
 0x2b0   : > { %1132 = vadd.xlane.f32.xlu0 %v1131_v43 }
 0x2b1   : > { %1126 = vadd.xlane.f32.xlu1 %v1125_v51 }
 0x2b4   : > { %1129 = vadd.xlane.f32.xlu0 %v1128_v50 }
 0x2b5   : > { %1135 = vadd.xlane.f32.xlu1 %v1134_v38 }
 0x2b8   : > { %1144 = vadd.xlane.f32.xlu0 %v1143_v59 }
 0x2b9   : > { %1138 = vadd.xlane.f32.xlu1 %v1137_v55 }
 0x2bc   : > { %1141 = vadd.xlane.f32.xlu0 %v1140_v33 }
 0x2bd   : > { %1147 = vadd.xlane.f32.xlu1 %v1146_v62 }
 0x2c0   : > { %1156 = vadd.xlane.f32.xlu0 %v1155_v48 }
 0x2c1   : > { %1150 = vadd.xlane.f32.xlu1 %v1149_v9 }
 0x2c4   : > { %v1739_v54 = vpop.xlane.xlu0 %1738  ;;  %1153 = vadd.xlane.f32.xlu0 %v1152_v1 }
 0x2c5   : > { %v1829_v17 = vsub.f32 %v4027_v29, %v1739_v54  ;;  %1159 = vadd.xlane.f32.xlu1 %v1158_v2 }
 0x2c6   : > { %v1742_v25 = vpop.xlane.xlu1 %1741 }
 0x2c7   : > { %v1863_v56 = vmul.f32 1.442695, %v1829_v17  ;;  %v1830_v60 = vsub.f32 %v4033_v36, %v1742_v25 }
 0x2c8   : > { %v1733_v12 = vpop.xlane.xlu0 %1732  ;;  %1165 = vadd.xlane.f32.xlu0 %v1164_v14 }
 0x2c9   : > { %3516 = vpow2.f32 %v1863_v56  ;;  %v1865_v23 = vmul.f32 1.442695, %v1830_v60  ;;  %v1827_v6 = vsub.f32 %v4029_v30, %v1733_v12  ;;  %1162 = vadd.xlane.f32.xlu1 %v1161_v0 }
 0x2ca   : > { %v1736_v4 = vpop.xlane.xlu1 %1735 }
 0x2cb   : > { %3518 = vpow2.f32 %v1865_v23  ;;  %v1859_v18 = vmul.f32 1.442695, %v1827_v6  ;;  %v1828_v29 = vsub.f32 %v4035_v37, %v1736_v4 }
 0x2cc   : > { %v1751_v57 = vpop.xlane.xlu0 %1750 }
 0x2cd   : > { %3520 = vpow2.f32 %v1859_v18  ;;  %v1861_v16 = vmul.f32 1.442695, %v1828_v29  ;;  %v1833_v36 = vsub.f32 %v4043_v45, %v1751_v57 }
 0x2ce   : > { %v1754_v32 = vpop.xlane.xlu1 %1753 }
 0x2cf   : > { %3522 = vpow2.f32 %v1861_v16  ;;  %v1871_v47 = vmul.f32 1.442695, %v1833_v36  ;;  %v1834_v27 = vsub.f32 %v4049_v52, %v1754_v32 }
 0x2d0   : > { %v1745_v11 = vpop.xlane.xlu0 %1744 }
 0x2d1   : > { %3524 = vpow2.f32 %v1871_v47  ;;  %v1873_v20 = vmul.f32 1.442695, %v1834_v27  ;;  %v1831_v30 = vsub.f32 %v4045_v46, %v1745_v11 }
 0x2d2   : > { %v1748_v10 = vpop.xlane.xlu1 %1747 }
 0x2d3   : > { %v4353_v40 = vpop.eup %3516  ;;  %3526 = vpow2.f32 %v1873_v20  ;;  %v1867_v37 = vmul.f32 1.442695, %v1831_v30  ;;  %v1832_v35 = vsub.f32 %v4051_v53, %v1748_v10 }
 0x2d4   : > { %v1763_v44 = vpop.xlane.xlu0 %1762  ;;  %v1929_v45 = vsel %vm884_vm3, %v4353_v40, 0.0 }
 0x2d5   : > { %v4358_v31 = vpop.eup %3518  ;;  %3528 = vpow2.f32 %v1867_v37  ;;  %v1869_v52 = vmul.f32 1.442695, %v1832_v35  ;;  %v1837_v8 = vsub.f32 %v4059_v61, %v1763_v44  ;;  %1930 = vadd.xlane.f32.xlu0 %v1929_v45  ;;  %v4759_v44 = vld [vmem:[#allocation2_spill] sm:$0xff] }
 0x2d6   : > { %v2020_v46 = vpack.c.bf16 %v4358_v31, %v4353_v40  ;;  %v1766_v58 = vpop.xlane.xlu1 %1765  ;;  %v1932_v43 = vsel %vm884_vm3, %v4358_v31, 0.0 }
 0x2d7   : > { %v3521_v51 = vpop.eup %3520  ;;  %3530 = vpow2.f32 %v1869_v52  ;;  %v1879_v53 = vmul.f32 1.442695, %v1837_v8  ;;  %v1838_v50 = vsub.f32 %v4065_v3, %v1766_v58  ;;  %1933 = vadd.xlane.f32.xlu1 %v1932_v43 }
 0x2d8   : > { %v1757_v38 = vpop.xlane.xlu0 %1756  ;;  %v1923_v59 = vsel %vm884_vm3, %v3521_v51, 0.0 }
 0x2d9   : > { %v3523_v55 = vpop.eup %3522  ;;  %3532 = vpow2.f32 %v1879_v53  ;;  %v1881_v61 = vmul.f32 1.442695, %v1838_v50  ;;  %v1835_v33 = vsub.f32 %v4061_v63, %v1757_v38  ;;  %1924 = vadd.xlane.f32.xlu0 %v1923_v59  ;;  %v4760_v38 = vld [vmem:[#allocation3_spill] sm:$0xff] }
 0x2da   : > { %v1760_v62 = vpop.xlane.xlu1 %1759  ;;  %v1926_v48 = vsel %vm884_vm3, %v3523_v55, 0.0  ;;  %v2019_v9 = vpack.c.bf16 %v3523_v55, %v3521_v51 }
 0x2db   : > { %v4369_v1 = vpop.eup %3524  ;;  %3534 = vpow2.f32 %v1881_v61  ;;  %v1875_v54 = vmul.f32 1.442695, %v1835_v33  ;;  %v1836_v3 = vsub.f32 %v4067_v5, %v1760_v62  ;;  %1927 = vadd.xlane.f32.xlu1 %v1926_v48  ;;  %v4761_v48 = vld [vmem:[#allocation4_spill] sm:$0xff] }
 0x2dc   : > { %v1775_v2 = vpop.xlane.xlu0 %1774  ;;  %3236 = vmatprep.mubr.msk.bf16.mxu0 %vm884_vm3, %v2019_v9  ;;  %v1941_v17 = vsel %vm884_vm3, %v4369_v1, 0.0 }
 0x2dd   : > { %v4375_v25 = vpop.eup %3526  ;;  %3536 = vpow2.f32 %v1875_v54  ;;  %v1877_v63 = vmul.f32 1.442695, %v1836_v3  ;;  %v1841_v56 = vsub.f32 %v4075_v13, %v1775_v2  ;;  %1942 = vadd.xlane.f32.xlu0 %v1941_v17 }
 0x2de   : > { %v1778_v60 = vpop.xlane.xlu1 %1777  ;;  %v1944_v14 = vsel %vm884_vm3, %v4375_v25, 0.0  ;;  %v2022_v5 = vpack.c.bf16 %v4375_v25, %v4369_v1  ;;  %v4763_v25 = vld [vmem:[#allocation6_spill] sm:$0xff] }
 0x2df   : > { %v3529_v12 = vpop.eup %3528  ;;  %3538 = vpow2.f32 %v1877_v63  ;;  %v1887_v0 = vmul.f32 1.442695, %v1841_v56  ;;  %v1842_v23 = vsub.f32 %v4081_v19, %v1778_v60  ;;  %1945 = vadd.xlane.f32.xlu1 %v1944_v14  ;;  %v4762_v60 = vld [vmem:[#allocation5_spill] sm:$0xff] }
 0x2e0   : > { %v1769_v6 = vpop.xlane.xlu0 %1768  ;;  %v1935_v4 = vsel %vm884_vm3, %v3529_v12, 0.0 }
 0x2e1   : > { %v3531_v18 = vpop.eup %3530  ;;  %3540 = vpow2.f32 %v1887_v0  ;;  %v1889_v13 = vmul.f32 1.442695, %v1842_v23  ;;  %v1839_v29 = vsub.f32 %v4077_v15, %v1769_v6  ;;  %1936 = vadd.xlane.f32.xlu0 %v1935_v4 }
 0x2e2   : > { %v1772_v57 = vpop.xlane.xlu1 %1771  ;;  %v1938_v16 = vsel %vm884_vm3, %v3531_v18, 0.0  ;;  %v2021_v36 = vpack.c.bf16 %v3531_v18, %v3529_v12 }
 0x2e3   : > { %v4386_v32 = vpop.eup %3532  ;;  %3542 = vpow2.f32 %v1889_v13  ;;  %v1883_v47 = vmul.f32 1.442695, %v1839_v29  ;;  %v1840_v19 = vsub.f32 %v4083_v21, %v1772_v57  ;;  %1939 = vadd.xlane.f32.xlu1 %v1938_v16  ;;  %v4764_v13 = vld [vmem:[#allocation7_spill] sm:$0xff] }
 0x2e4   : > { %v2039_v27 = vpop.permute.xlu0 %2038  ;;  %v1953_v11 = vsel %vm884_vm3, %v4386_v32, 0.0 }
 0x2e5   : > { %v3535_v20 = vpop.eup %3534  ;;  %3544 = vpow2.f32 %v1883_v47  ;;  %v1885_v30 = vmul.f32 1.442695, %v1840_v19  ;;  %v2089_v15 = vsel %vm1237_vm4, %v2039_v27, 0  ;;  %3320 = vmatprep.subr.msk.bf16.mxu0 %vm1237_vm4, %v2039_v27  ;;  %1954 = vadd.xlane.f32.xlu0 %v1953_v11  ;;  %v4765_v27 = vld [vmem:[#allocation8_spill] sm:$0xff] }
 0x2e6   : > { %3235 = vmatpush3.bf16.msra.mxu0 %v2089_v15  ;;  %v1787_v10 = vpop.xlane.xlu1 %1786  ;;  %v1956_v37 = vsel %vm884_vm3, %v3535_v20, 0.0  ;;  %v2024_v35 = vpack.c.bf16 %v3535_v20, %v4386_v32 }
 0x2e7   : > { %v3537_v21 = vpop.eup %3536  ;;  %3546 = vpow2.f32 %v1885_v30  ;;  %v1845_v45 = vsub.f32 %v4759_v44, %v1787_v10  ;;  %1957 = vadd.xlane.f32.xlu1 %v1956_v37 }
 0x2e8   : > { %v1947_v52 = vsel %vm884_vm3, %v3537_v21, 0.0 }
 0x2e9   : > { %v3539_v8 = vpop.eup %3538  ;;  %v1895_v58 = vmul.f32 1.442695, %v1845_v45  ;;  %1948 = vadd.xlane.f32.xlu0 %v1947_v52  ;;  %3237 = vmatmul.mubr.msk.bf16.vlgmr.msra.gmra.mrb[64].mxu0 %vm884_vm3, %v2020_v46 }
 0x2ea   : > { %3240 = vmatprep.mubr.msk.bf16.mxu0 %vm884_vm3, %v2021_v36  ;;  %v1781_v43 = vpop.xlane.xlu1 %1780  ;;  %v1950_v51 = vsel %vm884_vm3, %v3539_v8, 0.0  ;;  %v2023_v53 = vpack.c.bf16 %v3539_v8, %v3537_v21 }
 0x2eb   : > { %v3541_v50 = vpop.eup %3540  ;;  %3548 = vpow2.f32 %v1895_v58  ;;  %v1843_v59 = vsub.f32 %v4760_v38, %v1781_v43  ;;  %1951 = vadd.xlane.f32.xlu1 %v1950_v51 }
 0x2ec   : > { %v1965_v55 = vsel %vm884_vm3, %v3541_v50, 0.0 }
 0x2ed   : > { %v3543_v61 = vpop.eup %3542  ;;  %v1891_v33 = vmul.f32 1.442695, %v1843_v59  ;;  %1966 = vadd.xlane.f32.xlu0 %v1965_v55 }
 0x2ee   : > { %v1790_v62 = vpop.xlane.xlu1 %1789  ;;  %v1968_v40 = vsel %vm884_vm3, %v3543_v61, 0.0  ;;  %v2026_v31 = vpack.c.bf16 %v3543_v61, %v3541_v50 }
 0x2ef   : > { %v3545_v46 = vpop.eup %3544  ;;  %3550 = vpow2.f32 %v1891_v33  ;;  %v1846_v9 = vsub.f32 %v4761_v48, %v1790_v62  ;;  %1969 = vadd.xlane.f32.xlu1 %v1968_v40  ;;  %v4766_v48 = vld [vmem:[#allocation9_spill] sm:$0xff] }
 0x2f0   : > { %v1959_v54 = vsel %vm884_vm3, %v3545_v46, 0.0 }
 0x2f1   : > { %v3547_v3 = vpop.eup %3546  ;;  %v1897_v2 = vmul.f32 1.442695, %v1846_v9  ;;  %1960 = vadd.xlane.f32.xlu0 %v1959_v54  ;;  %3241 = vmatmul.mubr.msk.bf16.gmra.mrb[68].mxu0 %vm884_vm3, %v2022_v5 }
 0x2f2   : > { %3244 = vmatprep.mubr.msk.bf16.mxu0 %vm884_vm3, %v2023_v53  ;;  %v1784_v17 = vpop.xlane.xlu1 %1783  ;;  %v1962_v63 = vsel %vm884_vm3, %v3547_v3, 0.0  ;;  %v2025_v56 = vpack.c.bf16 %v3547_v3, %v3545_v46 }
 0x2f3   : > { %3552 = vpow2.f32 %v1897_v2  ;;  %v1844_v14 = vsub.f32 %v4762_v60, %v1784_v17  ;;  %1963 = vadd.xlane.f32.xlu1 %v1962_v63 }
 0x2f5   : > { %v3549_v12 = vpop.eup %3548  ;;  %v1893_v0 = vmul.f32 1.442695, %v1844_v14 }
 0x2f6   : > { %v1793_v23 = vpop.xlane.xlu1 %1792  ;;  %v1977_v6 = vsel %vm884_vm3, %v3549_v12, 0.0 }
 0x2f7   : > { %3554 = vpow2.f32 %v1893_v0  ;;  %1978 = vadd.xlane.f32.xlu0 %v1977_v6  ;;  %v1847_v5 = vsub.f32 %v4763_v25, %v1793_v23 }
 0x2f9   : > { %v3551_v1 = vpop.eup %3550  ;;  %3245 = vmatmul.mubr.msk.bf16.gmra.mrb[72].mxu0 %vm884_vm3, %v2024_v35  ;;  %v1899_v36 = vmul.f32 1.442695, %v1847_v5 }
 0x2fa   : > { %3248 = vmatprep.mubr.msk.bf16.mxu0 %vm884_vm3, %v2025_v56  ;;  %v1802_v4 = vpop.xlane.xlu1 %1801  ;;  %v1971_v18 = vsel %vm884_vm3, %v3551_v1, 0.0 }
 0x2fb   : > { %v1850_v29 = vsub.f32 %v4764_v13, %v1802_v4  ;;  %1972 = vadd.xlane.f32.xlu0 %v1971_v18 }
 0x2fd   : > { %v3553_v57 = vpop.eup %3552  ;;  %v1905_v16 = vmul.f32 1.442695, %v1850_v29 }
 0x2fe   : > { %v1796_v32 = vpop.xlane.xlu1 %1795  ;;  %v1980_v47 = vsel %vm884_vm3, %v3553_v57, 0.0  ;;  %v2028_v19 = vpack.c.bf16 %v3553_v57, %v3549_v12 }
 0x2ff   : > { %3556 = vpow2.f32 %v1905_v16  ;;  %v1848_v11 = vsub.f32 %v4765_v27, %v1796_v32  ;;  %1981 = vadd.xlane.f32.xlu1 %v1980_v47 }
 0x300   : > { %3558 = vpow2.f32 %v1899_v36 }
 0x301   : > { %v3555_v20 = vpop.eup %3554  ;;  %v1901_v30 = vmul.f32 1.442695, %v1848_v11  ;;  %3249 = vmatmul.mubr.msk.bf16.gmra.mrb[76].mxu0 %vm884_vm3, %v2026_v31 }
 0x302   : > { %v1811_v15 = vpop.xlane.xlu1 %1810  ;;  %v1974_v10 = vsel %vm884_vm3, %v3555_v20, 0.0  ;;  %v2027_v37 = vpack.c.bf16 %v3555_v20, %v3551_v1 }
 0x303   : > { %3560 = vpow2.f32 %v1901_v30  ;;  %1975 = vadd.xlane.f32.xlu1 %v1974_v10  ;;  %v1853_v35 = vsub.f32 %v4137_v34, %v1811_v15 }
 0x304   : > { %3252 = vmatprep.mubr.msk.bf16.mxu0 %vm884_vm3, %v2027_v37 }
 0x305   : > { %v1911_v45 = vmul.f32 1.442695, %v1853_v35 }
 0x306   : > { %v1805_v21 = vpop.xlane.xlu1 %1804 }
 0x307   : > { %v1851_v52 = vsub.f32 %v4144_v41, %v1805_v21  ;;  %3562 = vpow2.f32 %v1911_v45 }
 0x309   : > { %v4427_v44 = vpop.eup %3556  ;;  %3253 = vmatmul.mubr.msk.bf16.gmra.mrb[80].mxu0 %vm884_vm3, %v2028_v19  ;;  %v1907_v34 = vmul.f32 1.442695, %v1851_v52 }
 0x30a   : > { %v1814_v8 = vpop.xlane.xlu1 %1813  ;;  %v1992_v58 = vsel %vm884_vm3, %v4427_v44, 0.0  ;;  %v4434_v51 = vpop.eup %3558 }
 0x30b   : > { %v1854_v43 = vsub.f32 %v4147_v26, %v1814_v8  ;;  %1993 = vadd.xlane.f32.xlu1 %v1992_v58  ;;  %v1983_v11 = vsel %vm884_vm3, %v4434_v51, 0.0 }
 0x30d   : > { %v3561_v53 = vpop.eup %3560  ;;  %v1913_v50 = vmul.f32 1.442695, %v1854_v43 }
 0x30e   : > { %v1808_v38 = vpop.xlane.xlu1 %1807  ;;  %v1986_v59 = vsel %vm884_vm3, %v3561_v53, 0.0  ;;  %v2029_v55 = vpack.c.bf16 %v3561_v53, %v4434_v51 }
 0x30f   : > { %3564 = vpow2.f32 %v1913_v50  ;;  %v1852_v41 = vsub.f32 %v4151_v7, %v1808_v38  ;;  %1987 = vadd.xlane.f32.xlu1 %v1986_v59 }
 0x310   : > { %3256 = vmatprep.mubr.msk.bf16.mxu0 %vm884_vm3, %v2029_v55  ;;  %3566 = vpow2.f32 %v1907_v34 }
 0x311   : > { %v1909_v61 = vmul.f32 1.442695, %v1852_v41  ;;  %v3563_v54 = vpop.eup %3562 }
 0x312   : > { %v1817_v26 = vpop.xlane.xlu1 %1816  ;;  %v2001_v37 = vsel %vm884_vm3, %v3563_v54, 0.0 }
 0x313   : > { %3568 = vpow2.f32 %v1909_v61  ;;  %v1855_v33 = vsub.f32 %v4173_v24, %v1817_v26 }
 0x315   : > { %v1915_v62 = vmul.f32 1.442695, %v1855_v33  ;;  %v1799_v40 = vpop.xlane.xlu0 %1798 }
 0x316   : > { %v1849_v31 = vsub.f32 %v4109_v49, %v1799_v40  ;;  %v1820_v46 = vpop.xlane.xlu1 %1819 }
 0x317   : > { %v1856_v9 = vsub.f32 %v4766_v48, %v1820_v46  ;;  %3570 = vpow2.f32 %v1915_v62 }
 0x318   : > { %v1903_v3 = vmul.f32 1.442695, %v1849_v31 }
 0x319   : > { %v3565_v2 = vpop.eup %3564  ;;  %v1917_v7 = vmul.f32 1.442695, %v1856_v9  ;;  %v1823_v17 = vpop.xlane.xlu0 %1822 }
 0x31a   : > { %3572 = vpow2.f32 %v1903_v3  ;;  %v1857_v63 = vsub.f32 %v4166_v42, %v1823_v17  ;;  %v1826_v56 = vpop.xlane.xlu1 %1825  ;;  %v2004_v60 = vsel %vm884_vm3, %v3565_v2, 0.0  ;;  %v2032_v24 = vpack.c.bf16 %v3565_v2, %v3563_v54  ;;  %v3567_v49 = vpop.eup %3566 }
 0x31b   : > { %3574 = vpow2.f32 %v1917_v7  ;;  %v1858_v14 = vsub.f32 %v4177_v39, %v1826_v56  ;;  %2005 = vadd.xlane.f32.xlu1 %v2004_v60 }
 0x31c   : > { %v1919_v12 = vmul.f32 1.442695, %v1857_v63 }
 0x31d   : > { %v3569_v0 = vpop.eup %3568  ;;  %v1921_v23 = vmul.f32 1.442695, %v1858_v14  ;;  %v1079_v6 = vpop.xlane.xlu0 %1078 }
 0x31e   : > { %3576 = vpow2.f32 %v1919_v12  ;;  %v1082_v1 = vpop.xlane.xlu1 %1081  ;;  %v1998_v25 = vsel %vm884_vm3, %v3569_v0, 0.0  ;;  %v2031_v5 = vpack.c.bf16 %v3569_v0, %v3567_v49 }
 0x31f   : > { %3578 = vpow2.f32 %v1921_v23  ;;  %1999 = vadd.xlane.f32.xlu1 %v1998_v25 }
 0x321   : > { %v1085_v42 = vpop.xlane.xlu0 %1084  ;;  %v3571_v18 = vpop.eup %3570 }
 0x322   : > { %v1088_v4 = vpop.xlane.xlu1 %1087  ;;  %3580 = vrcp.f32 %v1085_v42  ;;  %v2007_v51 = vsel %vm884_vm3, %v3571_v18, 0.0 }
 0x323   : > { %3582 = vrcp.f32 %v1079_v6 }
 0x324   : > { %v3573_v13 = vpop.eup %3572  ;;  %3584 = vrcp.f32 %v1088_v4 }
 0x325   : > { %v3575_v29 = vpop.eup %3574  ;;  %v1091_v57 = vpop.xlane.xlu0 %1090  ;;  %v1989_v39 = vsel %vm884_vm3, %v3573_v13, 0.0  ;;  %v2030_v16 = vpack.c.bf16 %v4427_v44, %v3573_v13  ;;  %v1995_v44 = vsel %vm884_vm3, %v3567_v49, 0.0  ;;  %3586 = vrcp.f32 %v1082_v1 }
 0x326   : > { %1990 = vadd.xlane.f32.xlu0 %v1989_v39  ;;  %v1094_v36 = vpop.xlane.xlu1 %1093  ;;  %v2033_v32 = vpack.c.bf16 %v3575_v29, %v3571_v18  ;;  %v2010_v21 = vsel %vm884_vm3, %v3575_v29, 0.0 }
 0x327   : > { %3257 = vmatmul.mubr.msk.bf16.gmra.mrb[84].mxu0 %vm884_vm3, %v2030_v16 }
 0x328   : > { %v3577_v47 = vpop.eup %3576  ;;  %3260 = vmatprep.mubr.msk.bf16.mxu0 %vm884_vm3, %v2031_v5 }
 0x329   : > { %v3579_v19 = vpop.eup %3578  ;;  %v1097_v27 = vpop.xlane.xlu0 %1096  ;;  %v2013_v8 = vsel %vm884_vm3, %v3577_v47, 0.0 }
 0x32a   : > { %1984 = vadd.xlane.f32.xlu0 %v1983_v11  ;;  %v1100_v20 = vpop.xlane.xlu1 %1099  ;;  %v2016_v30 = vsel %vm884_vm3, %v3579_v19, 0.0  ;;  %v2034_v15 = vpack.c.bf16 %v3579_v19, %v3577_v47  ;;  %3588 = vrcp.f32 %v1097_v27 }
 0x32b   : > { %2017 = vadd.xlane.f32.xlu1 %v2016_v30  ;;  %3590 = vrcp.f32 %v1091_v57 }
 0x32c   : > { %v3581_v53 = vpop.eup %3580  ;;  %3592 = vrcp.f32 %v1100_v20 }
 0x32d   : > { %v1109_v10 = vpop.xlane.xlu0 %1108  ;;  %v3583_v34 = vpop.eup %3582  ;;  %3594 = vrcp.f32 %v1094_v36 }
 0x32e   : > { %2002 = vadd.xlane.f32.xlu0 %v2001_v37  ;;  %v1112_v35 = vpop.xlane.xlu1 %1111  ;;  %v3585_v55 = vpop.eup %3584  ;;  %3596 = vrcp.f32 %v1109_v10 }
 0x32f   : > { %3261 = vmatmul.mubr.msk.bf16.gmra.mrb[88].mxu0 %vm884_vm3, %v2032_v24  ;;  %2011 = vadd.xlane.f32.xlu1 %v2010_v21  ;;  %v3587_v26 = vpop.eup %3586 }
 0x330   : > { %3264 = vmatprep.mubr.msk.bf16.mxu0 %vm884_vm3, %v2033_v32 }
 0x331   : > { %v1103_v52 = vpop.xlane.xlu0 %1102 }
 0x332   : > { %1996 = vadd.xlane.f32.xlu0 %v1995_v44  ;;  %v1106_v45 = vpop.xlane.xlu1 %1105  ;;  %3598 = vrcp.f32 %v1103_v52 }
 0x333   : > { %3600 = vrcp.f32 %v1112_v35 }
 0x334   : > { %v3589_v9 = vpop.eup %3588  ;;  %3602 = vrcp.f32 %v1106_v45 }
 0x335   : > { %v1121_v43 = vpop.xlane.xlu0 %1120  ;;  %v3591_v2 = vpop.eup %3590 }
 0x336   : > { %2014 = vadd.xlane.f32.xlu0 %v2013_v8  ;;  %v1124_v58 = vpop.xlane.xlu1 %1123  ;;  %v3593_v63 = vpop.eup %3592  ;;  %3604 = vrcp.f32 %v1121_v43 }
 0x337   : > { %3265 = vmatmul.mubr.msk.bf16.gmra.mrb[92].mxu0 %vm884_vm3, %v2034_v15  ;;  %v3595_v24 = vpop.eup %3594 }
 0x338   : > { %v3597_v6 = vpop.eup %3596 }
 0x339   : > { %v1115_v31 = vpop.xlane.xlu0 %1114 }
 0x33a   : > { %2008 = vadd.xlane.f32.xlu0 %v2007_v51  ;;  %v1118_v33 = vpop.xlane.xlu1 %1117  ;;  %3606 = vrcp.f32 %v1115_v31 }
 0x33b   : > { %v3170_v50 = vpop.f32.mrb[32].mxu0  ;;  %3608 = vrcp.f32 %v1124_v58 }
 0x33c   : > { %v4462_v38 = vmul.f32 %v3581_v53, %v3170_v50  ;;  %v1275_v59 = vpop.f32.mrb[33].mxu0  ;;  %v3599_v25 = vpop.eup %3598  ;;  %3610 = vrcp.f32 %v1118_v33 }
 0x33d   : > { %v4464_v41 = vmul.f32 %v3583_v34, %v1275_v59  ;;  %v3171_v61 = vpop.f32.mrb[34].mxu0  ;;  %v1133_v54 = vpop.xlane.xlu0 %1132 }
 0x33e   : > { %v4466_v62 = vmul.f32 %v3585_v55, %v3171_v61  ;;  %v1278_v40 = vpop.f32.mrb[35].mxu0  ;;  %v1127_v48 = vpop.xlane.xlu1 %1126  ;;  %3612 = vrcp.f32 %v1133_v54 }
 0x33f   : > { %v4468_v46 = vmul.f32 %v3587_v26, %v1278_v40  ;;  %v3601_v4 = vpop.eup %3600  ;;  %3614 = vrcp.f32 %v1127_v48 }
 0x340   : > { %v3603_v29 = vpop.eup %3602 }
 0x341   : > { %v1130_v23 = vpop.xlane.xlu0 %1129  ;;  %v3605_v47 = vpop.eup %3604 }
 0x342   : > { %v1136_v0 = vpop.xlane.xlu1 %1135 }
 0x343   : > { %3616 = vrcp.f32 %v1136_v0 }
 0x344   : > { %v3607_v27 = vpop.eup %3606  ;;  %3618 = vrcp.f32 %v1130_v23 }
 0x345   : > { %v3174_v3 = vpop.f32.mrb[36].mxu0  ;;  %v1145_v36 = vpop.xlane.xlu0 %1144 }
 0x346   : > { %v4470_v7 = vmul.f32 %v3589_v9, %v3174_v3  ;;  %v1291_v17 = vpop.f32.mrb[37].mxu0  ;;  %v1139_v57 = vpop.xlane.xlu1 %1138  ;;  %3620 = vrcp.f32 %v1145_v36 }
 0x347   : > { %v4472_v56 = vmul.f32 %v3591_v2, %v1291_v17  ;;  %v3175_v60 = vpop.f32.mrb[38].mxu0  ;;  %v3609_v15 = vpop.eup %3608  ;;  %3622 = vrcp.f32 %v1139_v57 }
 0x348   : > { %v4474_v14 = vmul.f32 %v3593_v63, %v3175_v60  ;;  %v1294_v49 = vpop.f32.mrb[39].mxu0  ;;  %v3611_v21 = vpop.eup %3610 }
 0x349   : > { %v4476_v12 = vmul.f32 %v3595_v24, %v1294_v49  ;;  %v1142_v10 = vpop.xlane.xlu0 %1141  ;;  %v3613_v58 = vpop.eup %3612 }
 0x34a   : > { %v1148_v11 = vpop.xlane.xlu1 %1147  ;;  %v3615_v53 = vpop.eup %3614 }
 0x34b   : > { %3624 = vrcp.f32 %v1148_v11 }
 0x34c   : > { %3626 = vrcp.f32 %v1142_v10 }
 0x34d   : > { %v3178_v1 = vpop.f32.mrb[40].mxu0  ;;  %v1157_v43 = vpop.xlane.xlu0 %1156 }
 0x34e   : > { %v4478_v5 = vmul.f32 %v3597_v6, %v3178_v1  ;;  %v1307_v42 = vpop.f32.mrb[41].mxu0  ;;  %v1151_v8 = vpop.xlane.xlu1 %1150  ;;  %3628 = vrcp.f32 %v1157_v43 }
 0x34f   : > { %v4480_v18 = vmul.f32 %v3599_v25, %v1307_v42  ;;  %v3179_v13 = vpop.f32.mrb[42].mxu0  ;;  %v3617_v59 = vpop.eup %3616  ;;  %3630 = vrcp.f32 %v1151_v8 }
 0x350   : > { %v4482_v39 = vmul.f32 %v3601_v4, %v3179_v13  ;;  %v1310_v16 = vpop.f32.mrb[43].mxu0  ;;  %v3619_v26 = vpop.eup %3618 }
 0x351   : > { %v4484_v32 = vmul.f32 %v3603_v29, %v1310_v16  ;;  %v1154_v9 = vpop.xlane.xlu0 %1153  ;;  %v3621_v54 = vpop.eup %3620 }
 0x352   : > { %v1160_v48 = vpop.xlane.xlu1 %1159  ;;  %v3623_v2 = vpop.eup %3622 }
 0x353   : > { %3632 = vrcp.f32 %v1160_v48 }
 0x354   : > { %3634 = vrcp.f32 %v1154_v9  ;;  %v3447_v9 = vld [vmem:[%s4740_s4 + $0x18] sm:$0xff]  }
 0x355   : > { %v3182_v19 = vpop.f32.mrb[44].mxu0  ;;  %v3625_v60 = vpop.eup %3624 }
 0x356   : > { %v4486_v20 = vmul.f32 %v3605_v47, %v3182_v19  ;;  %v1323_v30 = vpop.f32.mrb[45].mxu0  ;;  %v3627_v0 = vpop.eup %3626 }
 0x357   : > { %v4488_v37 = vmul.f32 %v3607_v27, %v1323_v30  ;;  %v3183_v35 = vpop.f32.mrb[46].mxu0  ;;  %v1163_v1 = vpop.xlane.xlu1 %1162 }
 0x358   : > { %v4490_v44 = vmul.f32 %v3609_v15, %v3183_v35  ;;  %v1326_v45 = vpop.f32.mrb[47].mxu0  ;;  %v1166_v42 = vpop.xlane.xlu0 %1165  ;;  %3636 = vrcp.f32 %v1163_v1 }
 0x359   : > { %v4492_v52 = vmul.f32 %v3611_v21, %v1326_v45  ;;  %v3629_v4 = vpop.eup %3628  ;;  %3638 = vrcp.f32 %v1166_v42  ;;  %v3451_v42 = vld [vmem:[%s4740_s4 + $0x38] sm:$0xff]  }
 0x35a   : > { %v3631_v29 = vpop.eup %3630 }
 0x35d   : > { %v3186_v51 = vpop.f32.mrb[48].mxu0  ;;  %v3633_v36 = vpop.eup %3632 }
 0x35e   : > { %v4494_v50 = vmul.f32 %v3613_v58, %v3186_v51  ;;  %v1339_v34 = vpop.f32.mrb[49].mxu0  ;;  %v3635_v27 = vpop.eup %3634 }
 0x35f   : > { %v4496_v55 = vmul.f32 %v3615_v53, %v1339_v34  ;;  %v3187_v61 = vpop.f32.mrb[50].mxu0  ;;  %v3444_v34 = vld [vmem:[%s4740_s4] sm:$0xff]  }
 0x360   : > { %v4498_v33 = vmul.f32 %v3617_v59, %v3187_v61  ;;  %v1342_v40 = vpop.f32.mrb[51].mxu0  ;;  %3268 = vmatprep.subr.bf16.mxu1 %v3444_v34  ;;  %v3445_v61 = vld [vmem:[%s4740_s4 + $0x8] sm:$0xff]  }
 0x361   : > { %v4500_v31 = vmul.f32 %v3619_v26, %v1342_v40  ;;  %3269 = vmatpush3.bf16.msra.mxu1 %v3444_v34  ;;  %v3446_v26 = vld [vmem:[%s4740_s4 + $0x10] sm:$0xff]  }
 0x362   : > { %v3637_v35 = vpop.eup %3636  ;;  %v1931_v53 = vpop.xlane.xlu0 %1930  ;;  %3270 = vmatprep.subr.bf16.mxu1 %v3445_v61 }
 0x363   : > { %v3639_v58 = vpop.eup %3638  ;;  %3640 = vrcp.f32 %v1931_v53 }
 0x364   : > { %v1934_v59 = vpop.xlane.xlu1 %1933 }
 0x365   : > { %v3190_v3 = vpop.f32.mrb[52].mxu0  ;;  %3271 = vmatpush3.bf16.msra.mxu1 %v3445_v61  ;;  %3642 = vrcp.f32 %v1934_v59 }
 0x366   : > { %v4502_v17 = vmul.f32 %v3621_v54, %v3190_v3  ;;  %v1355_v63 = vpop.f32.mrb[53].mxu0  ;;  %v1925_v40 = vpop.xlane.xlu0 %1924  ;;  %3272 = vmatprep.subr.bf16.mxu1 %v3446_v26  ;;  %v3448_v3 = vld [vmem:[%s4740_s4 + $0x20] sm:$0xff]  }
 0x367   : > { %v4504_v24 = vmul.f32 %v3623_v2, %v1355_v63  ;;  %v3191_v49 = vpop.f32.mrb[54].mxu0  ;;  %v3449_v63 = vld [vmem:[%s4740_s4 + $0x28] sm:$0xff]   ;;  %3644 = vrcp.f32 %v1925_v40 }
 0x368   : > { %v4506_v23 = vmul.f32 %v3625_v60, %v3191_v49  ;;  %v1358_v6 = vpop.f32.mrb[55].mxu0  ;;  %v1928_v48 = vpop.xlane.xlu1 %1927 }
 0x369   : > { %v4508_v25 = vmul.f32 %v3627_v0, %v1358_v6  ;;  %3273 = vmatpush3.bf16.msra.mxu1 %v3446_v26  ;;  %v3450_v0 = vld [vmem:[%s4740_s4 + $0x30] sm:$0xff]   ;;  %3646 = vrcp.f32 %v1928_v48 }
 0x36a   : > { %v1943_v54 = vpop.xlane.xlu0 %1942  ;;  %3274 = vmatprep.subr.bf16.mxu1 %v3447_v9 }
 0x36b   : > { %3648 = vrcp.f32 %v1943_v54 }
 0x36c   : > { %v1946_v2 = vpop.xlane.xlu1 %1945 }
 0x36d   : > { %v3194_v13 = vpop.f32.mrb[56].mxu0  ;;  %3275 = vmatpush3.bf16.msra.mxu1 %v3447_v9  ;;  %3650 = vrcp.f32 %v1946_v2 }
 0x36e   : > { %v4510_v57 = vmul.f32 %v3629_v4, %v3194_v13  ;;  %v1371_v16 = vpop.f32.mrb[57].mxu0  ;;  %3276 = vmatprep.subr.bf16.mxu1 %v3448_v3  ;;  %v1937_v60 = vpop.xlane.xlu0 %1936 }
 0x36f   : > { %v4512_v47 = vmul.f32 %v3631_v29, %v1371_v16  ;;  %v3195_v19 = vpop.f32.mrb[58].mxu0  ;;  %v3641_v13 = vpop.eup %3640  ;;  %3652 = vrcp.f32 %v1937_v60 }
 0x370   : > { %v4514_v11 = vmul.f32 %v3633_v36, %v3195_v19  ;;  %v1374_v30 = vpop.f32.mrb[59].mxu0  ;;  %v1940_v49 = vpop.xlane.xlu1 %1939 }
 0x371   : > { %v4516_v15 = vmul.f32 %v3635_v27, %v1374_v30  ;;  %3277 = vmatpush3.bf16.msra.mxu1 %v3448_v3  ;;  %v3643_v36 = vpop.eup %3642  ;;  %3654 = vrcp.f32 %v1940_v49 }
 0x372   : > { %3278 = vmatprep.subr.bf16.mxu1 %v3449_v63  ;;  %v1955_v6 = vpop.xlane.xlu0 %1954  ;;  %v3645_v27 = vpop.eup %3644 }
 0x373   : > { %3656 = vrcp.f32 %v1955_v6 }
 0x374   : > { %v1958_v1 = vpop.xlane.xlu1 %1957 }
 0x375   : > { %v4518_v10 = vpop.f32.mrb[60].mxu0  ;;  %3279 = vmatpush3.bf16.msra.mxu1 %v3449_v63  ;;  %3658 = vrcp.f32 %v1958_v1 }
 0x376   : > { %v1387_v21 = vpop.f32.mrb[61].mxu0  ;;  %3280 = vmatprep.subr.bf16.mxu1 %v3450_v0  ;;  %v1949_v4 = vpop.xlane.xlu0 %1948 }
 0x377   : > { %v4520_v45 = vmul.f32 %v3637_v35, %v1387_v21  ;;  %v4522_v8 = vpop.f32.mrb[62].mxu0  ;;  %v3647_v35 = vpop.eup %3646  ;;  %3660 = vrcp.f32 %v1949_v4 }
 0x378   : > { %4767 = vst [vmem:[#allocation2_spill] sm:$0xff] %v4522_v8  ;;  %v1390_v43 = vpop.f32.mrb[63].mxu0  ;;  %v1952_v29 = vpop.xlane.xlu1 %1951 }
 0x379   : > { %v4524_v51 = vmul.f32 %v3639_v58, %v1390_v43  ;;  %3281 = vmatpush3.bf16.msra.mxu1 %v3450_v0  ;;  %v3649_v48 = vpop.eup %3648  ;;  %3662 = vrcp.f32 %v1952_v29 }
 0x37a   : > { %3282 = vmatprep.subr.bf16.mxu1 %v3451_v42  ;;  %v1967_v53 = vpop.xlane.xlu0 %1966  ;;  %v3651_v54 = vpop.eup %3650 }
 0x37b   : > { %v3653_v2 = vpop.eup %3652  ;;  %3664 = vrcp.f32 %v1967_v53 }
 0x37c   : > { %v1970_v26 = vpop.xlane.xlu1 %1969  ;;  %v3655_v49 = vpop.eup %3654 }
 0x37d   : > { %3283 = vmatpush3.bf16.msra.mxu1 %v3451_v42  ;;  %3666 = vrcp.f32 %v1970_v26 }
 0x37e   : > { %v1961_v63 = vpop.xlane.xlu0 %1960 }
 0x37f   : > { %3668 = vrcp.f32 %v1961_v63 }
 0x3bc   : > { %v3238_v16 = vpop.f32.mrb[64].mxu0 }
 0x3bd   : > { %v2125_v19 = vpop.f32.mrb[65].mxu0  ;;  %v2286_v21 = vmul.f32 %v3641_v13, %v3238_v16  ;;  %v1964_v13 = vpop.xlane.xlu1 %1963 }
 0x3be   : > { %v3239_v30 = vpop.f32.mrb[66].mxu0  ;;  %v2284_v34 = vmul.f32 %v3645_v27, %v2125_v19  ;;  %v1979_v19 = vpop.xlane.xlu0 %1978  ;;  %3670 = vrcp.f32 %v1964_v13 }
 0x3bf   : > { %v2287_v58 = vmul.f32 %v3643_v36, %v3239_v30  ;;  %v2128_v43 = vpop.f32.mrb[67].mxu0  ;;  %v3657_v27 = vpop.eup %3656  ;;  %3672 = vrcp.f32 %v1979_v19 }
 0x3c0   : > { %v2285_v59 = vmul.f32 %v3647_v35, %v2128_v43  ;;  %v3659_v35 = vpop.eup %3658 }
 0x3c1   : > { %v3346_v61 = vpack.i.bf16 %v2287_v58, %v2286_v21  ;;  %v1982_v29 = vpop.xlane.xlu1 %1981  ;;  %v3661_v58 = vpop.eup %3660 }
 0x3c2   : > { %v3351_v40 = vpack.i.bf16 %v2285_v59, %v2284_v34  ;;  %v3663_v34 = vpop.eup %3662 }
 0x3c3   : > { %3347 = vrot.lane.b32.xlu1 %v3346_v61, %s3732_s11 }
 0x3c4   : > { %v3242_v9 = vpop.f32.mrb[68].mxu0  ;;  %3352 = vrot.lane.b32.xlu0 %v3351_v40, %s3732_s11  ;;  %v1973_v40 = vpop.xlane.xlu0 %1972 }
 0x3c5   : > { %v2141_v3 = vpop.f32.mrb[69].mxu0  ;;  %v2290_v0 = vmul.f32 %v3649_v48, %v3242_v9  ;;  %3674 = vrcp.f32 %v1973_v40 }
 0x3c6   : > { %v3243_v60 = vpop.f32.mrb[70].mxu0  ;;  %v2288_v16 = vmul.f32 %v3653_v2, %v2141_v3  ;;  %v3665_v2 = vpop.eup %3664  ;;  %3676 = vrcp.f32 %v1982_v29 }
 0x3c7   : > { %v2291_v42 = vmul.f32 %v3651_v54, %v3243_v60  ;;  %v2144_v6 = vpop.f32.mrb[71].mxu0  ;;  %v1976_v54 = vpop.xlane.xlu1 %1975 }
 0x3c8   : > { %v2289_v1 = vmul.f32 %v3655_v49, %v2144_v6  ;;  %v3667_v60 = vpop.eup %3666  ;;  %3678 = vrcp.f32 %v1976_v54 }
 0x3c9   : > { %v3356_v36 = vpack.i.bf16 %v2291_v42, %v2290_v0  ;;  %v3669_v0 = vpop.eup %3668 }
 0x3ca   : > { %v3361_v4 = vpack.i.bf16 %v2289_v1, %v2288_v16  ;;  %v3671_v6 = vpop.eup %3670 }
 0x3cb   : > { %3357 = vrot.lane.b32.xlu1 %v3356_v36, %s3732_s11 }
 0x3cc   : > { %v3246_v30 = vpop.f32.mrb[72].mxu0  ;;  %3362 = vrot.lane.b32.xlu0 %v3361_v4, %s3732_s11 }
 0x3cd   : > { %v2157_v21 = vpop.f32.mrb[73].mxu0  ;;  %v2294_v59 = vmul.f32 %v3657_v27, %v3246_v30  ;;  %v3673_v30 = vpop.eup %3672 }
 0x3ce   : > { %v3247_v43 = vpop.f32.mrb[74].mxu0  ;;  %v2292_v48 = vmul.f32 %v3661_v58, %v2157_v21 }
 0x3cf   : > { %v2295_v61 = vmul.f32 %v3659_v35, %v3247_v43  ;;  %v2160_v53 = vpop.f32.mrb[75].mxu0  ;;  %v3675_v35 = vpop.eup %3674 }
 0x3d0   : > { %v2293_v26 = vmul.f32 %v3663_v34, %v2160_v53  ;;  %v3677_v58 = vpop.eup %3676 }
 0x3d1   : > { %v3366_v9 = vpack.i.bf16 %v2295_v61, %v2294_v59 }
 0x3d2   : > { %v3371_v3 = vpack.i.bf16 %v2293_v26, %v2292_v48  ;;  %v3679_v34 = vpop.eup %3678 }
 0x3d3   : > { %3367 = vrot.lane.b32.xlu1 %v3366_v9, %s3732_s11  ;;  %v1991_v9 = vpop.xlane.xlu0 %1990 }
 0x3d4   : > { %v3250_v63 = vpop.f32.mrb[76].mxu0  ;;  %3372 = vrot.lane.b32.xlu0 %v3371_v3, %s3732_s11  ;;  %v1994_v3 = vpop.xlane.xlu1 %1993 }
 0x3d5   : > { %v2173_v49 = vpop.f32.mrb[77].mxu0  ;;  %v2298_v13 = vmul.f32 %v3665_v2, %v3250_v63  ;;  %3680 = vrcp.f32 %v1994_v3 }
 0x3d6   : > { %v3251_v42 = vpop.f32.mrb[78].mxu0  ;;  %v2296_v36 = vmul.f32 %v3669_v0, %v2173_v49 }
 0x3d7   : > { %v2299_v16 = vmul.f32 %v3667_v60, %v3251_v42  ;;  %v2176_v1 = vpop.f32.mrb[79].mxu0  ;;  %v1985_v2 = vpop.xlane.xlu0 %1984 }
 0x3d8   : > { %v2297_v19 = vmul.f32 %v3671_v6, %v2176_v1  ;;  %v1988_v63 = vpop.xlane.xlu1 %1987 }
 0x3d9   : > { %v3376_v4 = vpack.i.bf16 %v2299_v16, %v2298_v13  ;;  %3682 = vrcp.f32 %v1988_v63 }
 0x3da   : > { %v3381_v27 = vpack.i.bf16 %v2297_v19, %v2296_v36  ;;  %3684 = vrcp.f32 %v1991_v9  ;;  %v1167_v36 = vsel %vm884_vm3, %v4292_v28, 0.0  ;;  %v1170_v9 = vsel %vm884_vm3, %v4295_v22, 0.0 }
 0x3db   : > { %3377 = vrot.lane.b32.xlu1 %v3376_v4, %s3732_s11  ;;  %v2003_v49 = vpop.xlane.xlu0 %2002  ;;  %3686 = vrcp.f32 %v1985_v2 }
 0x3dc   : > { %v3254_v29 = vpop.f32.mrb[80].mxu0  ;;  %3382 = vrot.lane.b32.xlu0 %v3381_v27, %s3732_s11  ;;  %v2006_v60 = vpop.xlane.xlu1 %2005 }
 0x3dd   : > { %v2189_v21 = vpop.f32.mrb[81].mxu0  ;;  %v4558_v59 = vmul.f32 %v3673_v30, %v3254_v29  ;;  %3688 = vrcp.f32 %v2006_v60 }
 0x3de   : > { %v3255_v43 = vpop.f32.mrb[82].mxu0  ;;  %v4562_v40 = vmul.f32 %v3675_v35, %v2189_v21 }
 0x3df   : > { %v4560_v61 = vmul.f32 %v3677_v58, %v3255_v43  ;;  %v2192_v53 = vpop.f32.mrb[83].mxu0  ;;  %v1997_v42 = vpop.xlane.xlu0 %1996 }
 0x3e0   : > { %v4564_v48 = vmul.f32 %v3679_v34, %v2192_v53  ;;  %v2000_v0 = vpop.xlane.xlu1 %1999  ;;  %v3681_v13 = vpop.eup %3680 }
 0x3e1   : > { %3690 = vrcp.f32 %v2000_v0 }
 0x3e2   : > { %3692 = vrcp.f32 %v2003_v49 }
 0x3e3   : > { %v2015_v16 = vpop.xlane.xlu0 %2014  ;;  %v3683_v19 = vpop.eup %3682  ;;  %3694 = vrcp.f32 %v1997_v42 }
 0x3e4   : > { %v2018_v6 = vpop.xlane.xlu1 %2017  ;;  %v3685_v27 = vpop.eup %3684 }
 0x3e5   : > { %v3687_v29 = vpop.eup %3686  ;;  %3696 = vrcp.f32 %v2018_v6 }
 0x3e7   : > { %v2009_v28 = vpop.xlane.xlu0 %2008  ;;  %v3689_v63 = vpop.eup %3688 }
 0x3e8   : > { %v2012_v43 = vpop.xlane.xlu1 %2011 }
 0x3e9   : > { %3698 = vrcp.f32 %v2012_v43 }
 0x3ea   : > { %3700 = vrcp.f32 %v2015_v16 }
 0x3eb   : > { %v3691_v49 = vpop.eup %3690  ;;  %3702 = vrcp.f32 %v2009_v28 }
 0x3ec   : > { %v3693_v42 = vpop.eup %3692 }
 0x3fa   : > { %v3258_v1 = vpop.f32.mrb[84].mxu0 }
 0x3fb   : > { %v2205_v4 = vpop.f32.mrb[85].mxu0  ;;  %1168 = vadd.xlane.f32.xlu0 %v1167_v36  ;;  %v2306_v35 = vmul.f32 %v3685_v27, %v3258_v1  ;;  %v3695_v1 = vpop.eup %3694 }
 0x3fc   : > { %v3259_v30 = vpop.f32.mrb[86].mxu0  ;;  %v2304_v34 = vmul.f32 %v3687_v29, %v2205_v4  ;;  %v3697_v6 = vpop.eup %3696 }
 0x3fd   : > { %v2307_v21 = vmul.f32 %v3681_v13, %v3259_v30  ;;  %v2208_v58 = vpop.f32.mrb[87].mxu0 }
 0x3fe   : > { %v2305_v53 = vmul.f32 %v3683_v19, %v2208_v58 }
 0x3ff   : > { %v3401_v3 = vpack.i.bf16 %v2307_v21, %v2306_v35  ;;  %1171 = vadd.xlane.f32.xlu1 %v1170_v9  ;;  %v3699_v21 = vpop.eup %3698 }
 0x400   : > { %v3396_v2 = vpack.i.bf16 %v2305_v53, %v2304_v34  ;;  %v3701_v43 = vpop.eup %3700 }
 0x401   : > { %v3703_v34 = vpop.eup %3702 }
 0x402   : > { %v3262_v60 = vpop.f32.mrb[88].mxu0 }
 0x403   : > { %v2221_v0 = vpop.f32.mrb[89].mxu0  ;;  %v2310_v36 = vmul.f32 %v3693_v42, %v3262_v60 }
 0x404   : > { %v3263_v13 = vpop.f32.mrb[90].mxu0  ;;  %v2308_v27 = vmul.f32 %v3695_v1, %v2221_v0 }
 0x405   : > { %v2311_v19 = vmul.f32 %v3689_v63, %v3263_v13  ;;  %v2224_v4 = vpop.f32.mrb[91].mxu0  ;;  %v4768_v63 = vpack.i.bf16 %v4560_v61, %v4558_v59 }
 0x406   : > { %v2309_v22 = vmul.f32 %v3691_v49, %v2224_v4  ;;  %v4769_v49 = vpack.i.bf16 %v4564_v48, %v4562_v40 }
 0x407   : > { %v3411_v30 = vpack.i.bf16 %v2311_v19, %v2310_v36 }
 0x408   : > { %v3406_v29 = vpack.i.bf16 %v2309_v22, %v2308_v27 }
 0x40a   : > { %v3266_v35 = vpop.f32.mrb[92].mxu0 }
 0x40b   : > { %v2237_v58 = vpop.f32.mrb[93].mxu0  ;;  %v2314_v53 = vmul.f32 %v3701_v43, %v3266_v35 }
 0x40c   : > { %v3267_v16 = vpop.f32.mrb[94].mxu0  ;;  %v2312_v54 = vmul.f32 %v3703_v34, %v2237_v58 }
 0x40d   : > { %v2315_v9 = vmul.f32 %v3697_v6, %v3267_v16  ;;  %v2240_v28 = vpop.f32.mrb[95].mxu0 }
 0x40e   : > { %v2313_v26 = vmul.f32 %v3699_v21, %v2240_v28 }
 0x40f   : > { %v3421_v8 = vpack.i.bf16 %v2315_v9, %v2314_v53 }
 0x410   : > { %v3416_v60 = vpack.i.bf16 %v2313_v26, %v2312_v54  ;;  %3392 = vrot.lane.b32.xlu1 %v4768_v63, %s3732_s11 }
 0x411   : > { %3387 = vrot.lane.b32.xlu0 %v4769_v49, %s3732_s11 }
 0x414   : > { %3397 = vrot.lane.b32.xlu1 %v3396_v2, %s3732_s11 }
 0x415   : > { %3407 = vrot.lane.b32.xlu0 %v3406_v29, %s3732_s11 }
 0x418   : > { %3402 = vrot.lane.b32.xlu1 %v3401_v3, %s3732_s11 }
 0x419   : > { %3417 = vrot.lane.b32.xlu0 %v3416_v60, %s3732_s11 }
 0x41c   : > { %3412 = vrot.lane.b32.xlu1 %v3411_v30, %s3732_s11 }
 0x420   : > { %3422 = vrot.lane.b32.xlu1 %v3421_v8, %s3732_s11  ;;  %s2988_s11 = sshll.u32 %s4776_s21, 8 }
 0x421   : > { %s4661_s16 = scalar_lea.vmem %s4742_s6, %s2988_s11 }
 0x435   : > { %v3348_v26 = vpop.permute.xlu1 %3347 }
 0x436   : > { %v3350_v59 = vunpack.i.h.bf16 %v3348_v26  ;;  %v3349_v61 = vunpack.i.l.bf16 %v3348_v26  ;;  %v3353_v54 = vpop.permute.xlu0 %3352 }
 0x437   : > { %v3355_v0 = vunpack.i.h.bf16 %v3353_v54  ;;  %v3354_v42 = vunpack.i.l.bf16 %v3353_v54 }
 0x438   : > { %v2447_v40 = vsel %vm671_vm2, %v4466_v62, %v3350_v59  ;;  %v2446_v48 = vsel %vm671_vm2, %v4462_v38, %v3349_v61 }
 0x439   : > { %v2477_v2 = vpack.c.bf16 %v2447_v40, %v2446_v48  ;;  %v2444_v3 = vsel %vm671_vm2, %v4464_v41, %v3354_v42  ;;  %v2445_v13 = vsel %vm671_vm2, %v4468_v46, %v3355_v0 }
 0x43a   : > { %v2476_v8 = vpack.c.bf16 %v2445_v13, %v2444_v3 }
 0x43c   : > { %3284 = vmatprep.mubr.bf16.mxu1 %v2476_v8 }
 0x43d   : > { %v3358_v1 = vpop.permute.xlu1 %3357  ;;  %3285 = vmatmul.mubr.bf16.vlgmr.msra.gmra.mrb[64].mxu1 %v2477_v2 }
 0x43e   : > { %v3360_v36 = vunpack.i.h.bf16 %v3358_v1  ;;  %v3359_v19 = vunpack.i.l.bf16 %v3358_v1  ;;  %v3363_v4 = vpop.permute.xlu0 %3362 }
 0x43f   : > { %v3365_v27 = vunpack.i.h.bf16 %v3363_v4  ;;  %v3364_v22 = vunpack.i.l.bf16 %v3363_v4 }
 0x440   : > { %v2450_v62 = vsel %vm671_vm2, %v4470_v7, %v3359_v19  ;;  %v2451_v38 = vsel %vm671_vm2, %v4474_v14, %v3360_v36 }
 0x441   : > { %v2448_v41 = vsel %vm671_vm2, %v4472_v56, %v3364_v22  ;;  %v2449_v46 = vsel %vm671_vm2, %v4476_v12, %v3365_v27  ;;  %v2479_v30 = vpack.c.bf16 %v2451_v38, %v2450_v62 }
 0x442   : > { %v2478_v29 = vpack.c.bf16 %v2449_v46, %v2448_v41 }
 0x444   : > { %3288 = vmatprep.mubr.bf16.mxu1 %v2478_v29 }
 0x445   : > { %v3368_v6 = vpop.permute.xlu1 %3367  ;;  %3289 = vmatmul.mubr.bf16.gmra.mrb[68].mxu1 %v2479_v30 }
 0x446   : > { %v3370_v35 = vunpack.i.h.bf16 %v3368_v6  ;;  %v3369_v21 = vunpack.i.l.bf16 %v3368_v6  ;;  %v3373_v58 = vpop.permute.xlu0 %3372 }
 0x447   : > { %v3375_v43 = vunpack.i.h.bf16 %v3373_v58  ;;  %v3374_v16 = vunpack.i.l.bf16 %v3373_v58 }
 0x448   : > { %v2454_v7 = vsel %vm671_vm2, %v4478_v5, %v3369_v21  ;;  %v2455_v14 = vsel %vm671_vm2, %v4482_v39, %v3370_v35 }
 0x449   : > { %v2452_v56 = vsel %vm671_vm2, %v4480_v18, %v3374_v16  ;;  %v2453_v12 = vsel %vm671_vm2, %v4484_v32, %v3375_v43  ;;  %v2481_v34 = vpack.c.bf16 %v2455_v14, %v2454_v7 }
 0x44a   : > { %v2480_v53 = vpack.c.bf16 %v2453_v12, %v2452_v56 }
 0x44c   : > { %3292 = vmatprep.mubr.bf16.mxu1 %v2480_v53 }
 0x44d   : > { %v3378_v9 = vpop.permute.xlu1 %3377  ;;  %3293 = vmatmul.mubr.bf16.gmra.mrb[72].mxu1 %v2481_v34 }
 0x44e   : > { %v3380_v28 = vunpack.i.h.bf16 %v3378_v9  ;;  %v3379_v60 = vunpack.i.l.bf16 %v3378_v9  ;;  %v3383_v63 = vpop.permute.xlu0 %3382 }
 0x44f   : > { %v3385_v49 = vunpack.i.h.bf16 %v3383_v63  ;;  %v3384_v26 = vunpack.i.l.bf16 %v3383_v63 }
 0x450   : > { %v2458_v5 = vsel %vm671_vm2, %v4486_v20, %v3379_v60  ;;  %v2459_v39 = vsel %vm671_vm2, %v4490_v44, %v3380_v28  ;;  %v4770_v28 = vld [vmem:[#allocation2_spill] sm:$0xff] }
 0x451   : > { %v2456_v18 = vsel %vm671_vm2, %v4488_v37, %v3384_v26  ;;  %v2457_v32 = vsel %vm671_vm2, %v4492_v52, %v3385_v49  ;;  %v2483_v59 = vpack.c.bf16 %v2459_v39, %v2458_v5 }
 0x452   : > { %v2482_v61 = vpack.c.bf16 %v2457_v32, %v2456_v18 }
 0x454   : > { %3296 = vmatprep.mubr.bf16.mxu1 %v2482_v61 }
 0x455   : > { %3297 = vmatmul.mubr.bf16.gmra.mrb[76].mxu1 %v2483_v59 }
 0x488   : > { %v1169_v54 = vpop.xlane.xlu0 %1168 }
 0x489   : > { %3704 = vrcp.f32 %v1169_v54 }
 0x48c   : > { %v3388_v0 = vpop.permute.xlu0 %3387  ;;  %v1172_v42 = vpop.xlane.xlu1 %1171 }
 0x48d   : > { %v3390_v40 = vunpack.i.h.bf16 %v3388_v0  ;;  %v3389_v48 = vunpack.i.l.bf16 %v3388_v0  ;;  %3706 = vrcp.f32 %v1172_v42 }
 0x48f   : > { %v2460_v20 = vsel %vm671_vm2, %v4496_v55, %v3389_v48  ;;  %v2461_v44 = vsel %vm671_vm2, %v4500_v31, %v3390_v40 }
 0x490   : > { %v3408_v2 = vpop.permute.xlu0 %3407  ;;  %v3393_v37 = vpop.permute.xlu1 %3392  ;;  %v2484_v3 = vpack.c.bf16 %v2461_v44, %v2460_v20 }
 0x491   : > { %v3410_v13 = vunpack.i.h.bf16 %v3408_v2  ;;  %v3409_v52 = vunpack.i.l.bf16 %v3408_v2  ;;  %v3395_v8 = vunpack.i.h.bf16 %v3393_v37  ;;  %v3394_v1 = vunpack.i.l.bf16 %v3393_v37 }
 0x492   : > { %3300 = vmatprep.mubr.bf16.mxu1 %v2484_v3 }
 0x493   : > { %v2462_v36 = vsel %vm671_vm2, %v4494_v50, %v3394_v1  ;;  %v2463_v19 = vsel %vm671_vm2, %v4498_v33, %v3395_v8  ;;  %v2468_v55 = vsel %vm671_vm2, %v4512_v47, %v3409_v52  ;;  %v2469_v31 = vsel %vm671_vm2, %v4516_v15, %v3410_v13  ;;  %v3705_v16 = vpop.eup %3704 }
 0x494   : > { %v3418_v4 = vpop.permute.xlu0 %3417  ;;  %v3398_v27 = vpop.permute.xlu1 %3397  ;;  %v2485_v22 = vpack.c.bf16 %v2463_v19, %v2462_v36  ;;  %v2488_v62 = vpack.c.bf16 %v2469_v31, %v2468_v55 }
 0x495   : > { %v3420_v38 = vunpack.i.h.bf16 %v3418_v4  ;;  %v3419_v41 = vunpack.i.l.bf16 %v3418_v4  ;;  %v3400_v46 = vunpack.i.h.bf16 %v3398_v27  ;;  %v3399_v30 = vunpack.i.l.bf16 %v3398_v27 }
 0x496   : > { %3301 = vmatmul.mubr.bf16.gmra.mrb[80].mxu1 %v2485_v22 }
 0x497   : > { %v2464_v50 = vsel %vm671_vm2, %v4504_v24, %v3399_v30  ;;  %v2465_v33 = vsel %vm671_vm2, %v4508_v25, %v3400_v46  ;;  %v2472_v47 = vsel %vm671_vm2, %v4520_v45, %v3419_v41  ;;  %v2473_v15 = vsel %vm671_vm2, %v4524_v51, %v3420_v38  ;;  %v3707_v56 = vpop.eup %3706 }
 0x498   : > { %v3403_v29 = vpop.permute.xlu1 %3402  ;;  %v2486_v6 = vpack.c.bf16 %v2465_v33, %v2464_v50  ;;  %v2490_v35 = vpack.c.bf16 %v2473_v15, %v2472_v47  ;;  %v1465_v60 = vmul.f32 %v3707_v56, %v4770_v28 }
 0x499   : > { %v3405_v21 = vunpack.i.h.bf16 %v3403_v29  ;;  %v3404_v58 = vunpack.i.l.bf16 %v3403_v29 }
 0x49a   : > { %3304 = vmatprep.mubr.bf16.mxu1 %v2486_v6 }
 0x49b   : > { %v2466_v43 = vsel %vm671_vm2, %v4502_v17, %v3404_v58  ;;  %v2467_v24 = vsel %vm671_vm2, %v4506_v23, %v3405_v21  ;;  %v1464_v23 = vmul.f32 %v3705_v16, %v4518_v10 }
 0x49c   : > { %v3413_v25 = vpop.permute.xlu1 %3412  ;;  %v2487_v7 = vpack.c.bf16 %v2467_v24, %v2466_v43 }
 0x49d   : > { %v3415_v14 = vunpack.i.h.bf16 %v3413_v25  ;;  %v3414_v45 = vunpack.i.l.bf16 %v3413_v25 }
 0x49e   : > { %3305 = vmatmul.mubr.bf16.gmra.mrb[84].mxu1 %v2487_v7 }
 0x49f   : > { %3308 = vmatprep.mubr.bf16.mxu1 %v2488_v62  ;;  %v2470_v51 = vsel %vm671_vm2, %v4510_v57, %v3414_v45  ;;  %v2471_v12 = vsel %vm671_vm2, %v4514_v11, %v3415_v14  ;;  %v4656_v57 = vld [vmem:[%s4741_s5] ss:$0 sm:$0xff] }
 0x4a0   : > { %v3423_v34 = vpop.permute.xlu1 %3422  ;;  %v2489_v17 = vpack.c.bf16 %v2471_v12, %v2470_v51 }
 0x4a1   : > { %v3425_v53 = vunpack.i.h.bf16 %v3423_v34  ;;  %v3424_v9 = vunpack.i.l.bf16 %v3423_v34 }
 0x4a3   : > { %v2474_v63 = vsel %vm671_vm2, %v1464_v23, %v3424_v9  ;;  %v2475_v49 = vsel %vm671_vm2, %v1465_v60, %v3425_v53 }
 0x4a4   : > { %v2491_v26 = vpack.c.bf16 %v2475_v49, %v2474_v63 }
 0x4a6   : > { %3309 = vmatmul.mubr.bf16.gmra.mrb[88].mxu1 %v2489_v17 }
 0x4a7   : > { %3312 = vmatprep.mubr.bf16.mxu1 %v2490_v35 }
 0x4ae   : > { %3313 = vmatmul.mubr.bf16.gmra.mrb[92].mxu1 %v2491_v26 }
 0x510   : > { %v3286_v11 = vpop.f32.mrb[64].mxu1 }
 0x511   : > { %v2606_v10 = vadd.f32 %v3286_v11, %v4656_v57  ;;  %v2597_v5 = vpop.f32.mrb[65].mxu1 }
 0x512   : > { %v2598_v39 = vadd.f32 %v4656_v57, %v2597_v5  ;;  %v3287_v18 = vpop.f32.mrb[66].mxu1 }
 0x513   : > { %2726 = vst [vmem:[%s4661_s16 + $0x10] sm:$0xff] %v2606_v10  ;;  %v2609_v32 = vadd.f32 %v3287_v18, %v4656_v57  ;;  %v2600_v59 = vpop.f32.mrb[67].mxu1 }
 0x514   : > { %2724 = vst [vmem:[%s4661_s16] sm:$0xff] %v2598_v39  ;;  %v2601_v61 = vadd.f32 %v4656_v57, %v2600_v59 }
 0x515   : > { %2727 = vst [vmem:[%s4661_s16 + $0x18] sm:$0xff] %v2609_v32 }
 0x516   : > { %2725 = vst [vmem:[%s4661_s16 + $0x8] sm:$0xff] %v2601_v61 }
 0x518   : > { %v3290_v54 = vpop.f32.mrb[68].mxu1 }
 0x519   : > { %v2622_v0 = vadd.f32 %v3290_v54, %v4656_v57  ;;  %v2613_v42 = vpop.f32.mrb[69].mxu1 }
 0x51a   : > { %v2614_v40 = vadd.f32 %v4656_v57, %v2613_v42  ;;  %v3291_v48 = vpop.f32.mrb[70].mxu1 }
 0x51b   : > { %2730 = vst [vmem:[%s4661_s16 + $0x30] sm:$0xff] %v2622_v0  ;;  %v2625_v20 = vadd.f32 %v3291_v48, %v4656_v57  ;;  %v2616_v44 = vpop.f32.mrb[71].mxu1 }
 0x51c   : > { %2728 = vst [vmem:[%s4661_s16 + $0x20] sm:$0xff] %v2614_v40  ;;  %v2617_v2 = vadd.f32 %v4656_v57, %v2616_v44 }
 0x51d   : > { %2731 = vst [vmem:[%s4661_s16 + $0x38] sm:$0xff] %v2625_v20 }
 0x51e   : > { %2729 = vst [vmem:[%s4661_s16 + $0x28] sm:$0xff] %v2617_v2 }
 0x520   : > { %v3294_v37 = vpop.f32.mrb[72].mxu1 }
 0x521   : > { %v2638_v3 = vadd.f32 %v3294_v37, %v4656_v57  ;;  %v2629_v13 = vpop.f32.mrb[73].mxu1 }
 0x522   : > { %v2630_v52 = vadd.f32 %v4656_v57, %v2629_v13  ;;  %v3295_v8 = vpop.f32.mrb[74].mxu1 }
 0x523   : > { %2734 = vst [vmem:[%s4661_s16 + $0x50] sm:$0xff] %v2638_v3  ;;  %v2641_v1 = vadd.f32 %v3295_v8, %v4656_v57  ;;  %v2632_v36 = vpop.f32.mrb[75].mxu1 }
 0x524   : > { %2732 = vst [vmem:[%s4661_s16 + $0x40] sm:$0xff] %v2630_v52  ;;  %v2633_v19 = vadd.f32 %v4656_v57, %v2632_v36 }
 0x525   : > { %2735 = vst [vmem:[%s4661_s16 + $0x58] sm:$0xff] %v2641_v1 }
 0x526   : > { %2733 = vst [vmem:[%s4661_s16 + $0x48] sm:$0xff] %v2633_v19 }
 0x528   : > { %v3298_v55 = vpop.f32.mrb[76].mxu1 }
 0x529   : > { %v2654_v31 = vadd.f32 %v3298_v55, %v4656_v57  ;;  %v2645_v4 = vpop.f32.mrb[77].mxu1 }
 0x52a   : > { %v2646_v27 = vadd.f32 %v4656_v57, %v2645_v4  ;;  %v3299_v22 = vpop.f32.mrb[78].mxu1 }
 0x52b   : > { %2738 = vst [vmem:[%s4661_s16 + $0x70] sm:$0xff] %v2654_v31  ;;  %v2657_v62 = vadd.f32 %v3299_v22, %v4656_v57  ;;  %v2648_v38 = vpop.f32.mrb[79].mxu1 }
 0x52c   : > { %2736 = vst [vmem:[%s4661_s16 + $0x60] sm:$0xff] %v2646_v27  ;;  %v2649_v41 = vadd.f32 %v4656_v57, %v2648_v38 }
 0x52d   : > { %2739 = vst [vmem:[%s4661_s16 + $0x78] sm:$0xff] %v2657_v62 }
 0x52e   : > { %2737 = vst [vmem:[%s4661_s16 + $0x68] sm:$0xff] %v2649_v41 }
 0x569   : > { %v3302_v46 = vpop.f32.mrb[80].mxu1 }
 0x56a   : > { %v2670_v30 = vadd.f32 %v3302_v46, %v4656_v57  ;;  %v2661_v50 = vpop.f32.mrb[81].mxu1 }
 0x56b   : > { %v2662_v33 = vadd.f32 %v4656_v57, %v2661_v50  ;;  %v3303_v47 = vpop.f32.mrb[82].mxu1 }
 0x56c   : > { %2742 = vst [vmem:[%s4661_s16 + $0x90] sm:$0xff] %v2670_v30  ;;  %v2673_v15 = vadd.f32 %v3303_v47, %v4656_v57  ;;  %v2664_v29 = vpop.f32.mrb[83].mxu1 }
 0x56d   : > { %2740 = vst [vmem:[%s4661_s16 + $0x80] sm:$0xff] %v2662_v33  ;;  %v2665_v6 = vadd.f32 %v4656_v57, %v2664_v29 }
 0x56e   : > { %2743 = vst [vmem:[%s4661_s16 + $0x98] sm:$0xff] %v2673_v15 }
 0x56f   : > { %2741 = vst [vmem:[%s4661_s16 + $0x88] sm:$0xff] %v2665_v6 }
 0x571   : > { %v3306_v35 = vpop.f32.mrb[84].mxu1 }
 0x572   : > { %v2686_v21 = vadd.f32 %v3306_v35, %v4656_v57  ;;  %v2677_v58 = vpop.f32.mrb[85].mxu1 }
 0x573   : > { %v2678_v43 = vadd.f32 %v4656_v57, %v2677_v58  ;;  %v3307_v24 = vpop.f32.mrb[86].mxu1 }
 0x574   : > { %2746 = vst [vmem:[%s4661_s16 + $0xb0] sm:$0xff] %v2686_v21  ;;  %v2689_v16 = vadd.f32 %v3307_v24, %v4656_v57  ;;  %v2680_v25 = vpop.f32.mrb[87].mxu1 }
 0x575   : > { %2744 = vst [vmem:[%s4661_s16 + $0xa0] sm:$0xff] %v2678_v43  ;;  %v2681_v7 = vadd.f32 %v4656_v57, %v2680_v25 }
 0x576   : > { %2747 = vst [vmem:[%s4661_s16 + $0xb8] sm:$0xff] %v2689_v16 }
 0x577   : > { %2745 = vst [vmem:[%s4661_s16 + $0xa8] sm:$0xff] %v2681_v7 }
 0x579   : > { %v3310_v14 = vpop.f32.mrb[88].mxu1 }
 0x57a   : > { %v2702_v45 = vadd.f32 %v3310_v14, %v4656_v57  ;;  %v2693_v56 = vpop.f32.mrb[89].mxu1 }
 0x57b   : > { %v2694_v51 = vadd.f32 %v4656_v57, %v2693_v56  ;;  %v3311_v12 = vpop.f32.mrb[90].mxu1 }
 0x57c   : > { %2750 = vst [vmem:[%s4661_s16 + $0xd0] sm:$0xff] %v2702_v45  ;;  %v2705_v34 = vadd.f32 %v3311_v12, %v4656_v57  ;;  %v2696_v17 = vpop.f32.mrb[91].mxu1 }
 0x57d   : > { %2748 = vst [vmem:[%s4661_s16 + $0xc0] sm:$0xff] %v2694_v51  ;;  %v2697_v53 = vadd.f32 %v4656_v57, %v2696_v17 }
 0x57e   : > { %2751 = vst [vmem:[%s4661_s16 + $0xd8] sm:$0xff] %v2705_v34 }
 0x57f   : > { %2749 = vst [vmem:[%s4661_s16 + $0xc8] sm:$0xff] %v2697_v53 }
 0x581   : > { %v3314_v9 = vpop.f32.mrb[92].mxu1 }
 0x582   : > { %v2718_v23 = vadd.f32 %v3314_v9, %v4656_v57  ;;  %v2709_v28 = vpop.f32.mrb[93].mxu1 }
 0x583   : > { %v2710_v60 = vadd.f32 %v4656_v57, %v2709_v28  ;;  %v3315_v63 = vpop.f32.mrb[94].mxu1 }
 0x584   : > { %2754 = vst [vmem:[%s4661_s16 + $0xf0] sm:$0xff] %v2718_v23  ;;  %v2721_v49 = vadd.f32 %v3315_v63, %v4656_v57  ;;  %v2712_v26 = vpop.f32.mrb[95].mxu1 }
 0x585   : > { %2752 = vst [vmem:[%s4661_s16 + $0xe0] sm:$0xff] %v2710_v60  ;;  %v2713_v11 = vadd.f32 %v4656_v57, %v2712_v26 }
 0x586   : > { %2755 = vst [vmem:[%s4661_s16 + $0xf8] sm:$0xff] %v2721_v49 }
 0x587   : > { %2753 = vst [vmem:[%s4661_s16 + $0xe8] sm:$0xff] %v2713_v11 }
 0x588 PF: > { %s16_s23 = sadd.s32 1, %s3730_s23   ;;  %s4771_s21 = smov %s3726_s22 }
 0x589   : > { %p13_p5 = scmp.ge.s32.totalorder %s16_s23, 4   ;;  %s4772_s22 = smov %s4774_s24 }
 0x58b   :  { %15 = sbr.rel (!%p13_p5) target bundleno = 2 (0x2), region = 80 }

</bundles_post_ra>
